<compile_context>
chip_gen: v6e
topology: v6e:2x2x1
jax: 0.10.0
libtpu: 0.0.40
codegen_flags: <defaults>
</compile_context>

<pallas_src>
import functools
import math

import jax
import jax.numpy as jnp
from jax.experimental import pallas as pl
from jax.experimental.pallas import tpu as pltpu


VMEM_LIMIT = 32 * 1024 * 1024  # safe on v5e/v6e/v7x


def _pick_tile(dim, target, align):
    """Largest tile <= target that divides dim and is a multiple of align; else dim."""
    if dim <= target:
        return dim
    t = (target // align) * align
    while t >= align:
        if dim % t == 0:
            return t
        t -= align
    return dim


def _gelu_tanh(y):
    c = math.sqrt(2.0 / math.pi)
    return 0.5 * y * (1.0 + jnp.tanh(c * (y + 0.044715 * y * y * y)))


# ----------------------------------------------------------------------------
# Kernels
# ----------------------------------------------------------------------------
def _matmul_kernel(x_ref, w_ref, b_ref, o_ref, acc_ref, *, activation):
    """Tiled x @ w + b (optional GELU).  grid = (M tiles, N tiles, K tiles)."""
    @pl.when(pl.program_id(2) == 0)
    def _init():
        acc_ref[...] = jnp.zeros_like(acc_ref)

    acc_ref[...] += jnp.dot(
        x_ref[...].astype(jnp.float32),
        w_ref[...].astype(jnp.float32),
        preferred_element_type=jnp.float32,
    )

    @pl.when(pl.program_id(2) == pl.num_programs(2) - 1)
    def _finish():
        y = acc_ref[...] + b_ref[...].astype(jnp.float32)
        if activation == "gelu":
            y = _gelu_tanh(y)
        o_ref[...] = y.astype(o_ref.dtype)


def _matmul_res_ln_kernel(x_ref, w_ref, b_ref, res_ref, g_ref, be_ref,
                          o_ref, acc_ref, *, eps):
    """Tiled x @ w + b, fused with residual add + LayerNorm epilogue.

    grid = (M tiles, K tiles); output block covers the full hidden dim so the
    LN statistics see the whole row.
    """
    @pl.when(pl.program_id(1) == 0)
    def _init():
        acc_ref[...] = jnp.zeros_like(acc_ref)

    acc_ref[...] += jnp.dot(
        x_ref[...].astype(jnp.float32),
        w_ref[...].astype(jnp.float32),
        preferred_element_type=jnp.float32,
    )

    @pl.when(pl.program_id(1) == pl.num_programs(1) - 1)
    def _finish():
        y = acc_ref[...] + b_ref[...].astype(jnp.float32) + res_ref[...].astype(jnp.float32)
        mean = jnp.mean(y, axis=-1, keepdims=True)
        var = jnp.mean((y - mean) ** 2, axis=-1, keepdims=True)
        yn = (y - mean) * jax.lax.rsqrt(var + eps)
        o_ref[...] = (yn * g_ref[...].astype(jnp.float32)
                      + be_ref[...].astype(jnp.float32)).astype(o_ref.dtype)


def _embed_ln_kernel(w_ref, p_ref, t_ref, g_ref, b_ref, o_ref, *, eps):
    """Fused (word_emb + pos_emb + type_emb) + LayerNorm."""
    x = (w_ref[...].astype(jnp.float32)
         + p_ref[...].astype(jnp.float32)
         + t_ref[...].astype(jnp.float32))
    mean = jnp.mean(x, axis=-1, keepdims=True)
    var = jnp.mean((x - mean) ** 2, axis=-1, keepdims=True)
    y = (x - mean) * jax.lax.rsqrt(var + eps)
    o_ref[...] = (y * g_ref[...].astype(jnp.float32)
                  + b_ref[...].astype(jnp.float32)).astype(o_ref.dtype)


def _mha_kernel(q_ref, kv_ref, m_ref, o_ref, *, heads, scale):
    """All heads for one query tile, straight from the fused QKV tensor.

    q_ref : (tq, 3H) query-tile view of qkv
    kv_ref: (S , 3H) full qkv (keys/values)
    m_ref : (1 , S ) additive mask
    o_ref : (tq, H ) lane-dense merged-heads output
    """
    H = kv_ref.shape[1] // 3
    d = H // heads
    mask = m_ref[...].astype(jnp.float32)

    outs = []
    for h in range(heads):
        # scale applied to the small [tq, d] query tile, not the [tq, S] scores
        q = q_ref[:, h * d:(h + 1) * d].astype(jnp.float32) * scale
        k = kv_ref[:, H + h * d:H + (h + 1) * d].astype(jnp.float32)
        v = kv_ref[:, 2 * H + h * d:2 * H + (h + 1) * d].astype(jnp.float32)

        # contract on the last dims -- no explicit k.T (avoids XLU transpose)
        s = jax.lax.dot_general(q, k, (((1,), (1,)), ((), ())),
                                preferred_element_type=jnp.float32)
        s = s + mask
        s = s - jnp.max(s, axis=-1, keepdims=True)
        p = jnp.exp(s)
        inv = pl.reciprocal(jnp.sum(p, axis=-1, keepdims=True), approx=True)
        ctx = jnp.dot(p, v, preferred_element_type=jnp.float32) * inv
        outs.append(ctx)

    # single lane-dense store of the merged-heads slab
    o_ref[...] = jnp.concatenate(outs, axis=-1).astype(o_ref.dtype)


# ----------------------------------------------------------------------------
# Wrappers
# ----------------------------------------------------------------------------
def linear(x, w, b, activation=None, *, tm=256, tn=512, tk=512):
    S, H = x.shape
    O = w.shape[1]
    tm = _pick_tile(S, tm, 8)
    tn = _pick_tile(O, tn, 128)
    tk = _pick_tile(H, tk, 128)
    kernel = functools.partial(_matmul_kernel, activation=activation)
    return pl.pallas_call(
        kernel,
        out_shape=jax.ShapeDtypeStruct((S, O), x.dtype),
        grid=(S // tm, O // tn, H // tk),
        in_specs=[
            pl.BlockSpec((tm, tk), lambda i, j, k: (i, k)),
            pl.BlockSpec((tk, tn), lambda i, j, k: (k, j)),
            pl.BlockSpec((1, tn), lambda i, j, k: (0, j)),
        ],
        out_specs=pl.BlockSpec((tm, tn), lambda i, j, k: (i, j)),
        scratch_shapes=[pltpu.VMEM((tm, tn), jnp.float32)],
        compiler_params=pltpu.CompilerParams(
            dimension_semantics=("parallel", "parallel", "arbitrary"),
            vmem_limit_bytes=VMEM_LIMIT),
    )(x, w, b.reshape(1, O))


def linear_residual_ln(x, w, b, residual, gamma, beta, *, eps=1e-12, tm=256, tk=512):
    S, K = x.shape
    O = w.shape[1]
    tm = _pick_tile(S, tm, 8)
    tk = _pick_tile(K, tk, 128)
    kernel = functools.partial(_matmul_res_ln_kernel, eps=eps)
    return pl.pallas_call(
        kernel,
        out_shape=jax.ShapeDtypeStruct((S, O), x.dtype),
        grid=(S // tm, K // tk),
        in_specs=[
            pl.BlockSpec((tm, tk), lambda i, k: (i, k)),
            pl.BlockSpec((tk, O), lambda i, k: (k, 0)),
            pl.BlockSpec((1, O), lambda i, k: (0, 0)),
            pl.BlockSpec((tm, O), lambda i, k: (i, 0)),
            pl.BlockSpec((1, O), lambda i, k: (0, 0)),
            pl.BlockSpec((1, O), lambda i, k: (0, 0)),
        ],
        out_specs=pl.BlockSpec((tm, O), lambda i, k: (i, 0)),
        scratch_shapes=[pltpu.VMEM((tm, O), jnp.float32)],
        compiler_params=pltpu.CompilerParams(
            dimension_semantics=("parallel", "arbitrary"),
            vmem_limit_bytes=VMEM_LIMIT),
    )(x, w, b.reshape(1, O), residual, gamma.reshape(1, O), beta.reshape(1, O))


def embed_layer_norm(word, pos, type_row, gamma, beta, eps=1e-12, *, tm=256):
    S, H = word.shape
    tm = _pick_tile(S, tm, 8)
    kernel = functools.partial(_embed_ln_kernel, eps=eps)
    return pl.pallas_call(
        kernel,
        out_shape=jax.ShapeDtypeStruct((S, H), word.dtype),
        grid=(S // tm,),
        in_specs=[
            pl.BlockSpec((tm, H), lambda i: (i, 0)),
            pl.BlockSpec((tm, H), lambda i: (i, 0)),
            pl.BlockSpec((1, H), lambda i: (0, 0)),
            pl.BlockSpec((1, H), lambda i: (0, 0)),
            pl.BlockSpec((1, H), lambda i: (0, 0)),
        ],
        out_specs=pl.BlockSpec((tm, H), lambda i: (i, 0)),
        compiler_params=pltpu.CompilerParams(
            dimension_semantics=("parallel",),
            vmem_limit_bytes=VMEM_LIMIT),
    )(word, pos, type_row.reshape(1, H), gamma.reshape(1, H), beta.reshape(1, H))


def multi_head_attention(qkv, mask_add, heads, *, tq=256):
    """qkv: [S, 3H] fused projections; mask_add: [1, S] additive bias -> [S, H]."""
    S, H3 = qkv.shape
    H = H3 // 3
    d = H // heads
    tq = _pick_tile(S, tq, 8)
    kernel = functools.partial(_mha_kernel, heads=heads, scale=1.0 / math.sqrt(d))
    return pl.pallas_call(
        kernel,
        out_shape=jax.ShapeDtypeStruct((S, H), qkv.dtype),
        grid=(S // tq,),
        in_specs=[
            pl.BlockSpec((tq, H3), lambda i: (i, 0)),   # query tile view of qkv
            pl.BlockSpec((S, H3), lambda i: (0, 0)),    # full K/V (resident)
            pl.BlockSpec((1, S), lambda i: (0, 0)),
        ],
        out_specs=pl.BlockSpec((tq, H), lambda i: (i, 0)),
        compiler_params=pltpu.CompilerParams(
            dimension_semantics=("parallel",),
            vmem_limit_bytes=VMEM_LIMIT),
    )(qkv, qkv, mask_add)


# ----------------------------------------------------------------------------
# Synthetic BERT-ish encoder (deterministic parameters)
# ----------------------------------------------------------------------------
def init_params(key, *, vocab, max_pos, hidden, heads, inter, layers):
    keys = iter(jax.random.split(key, 4 + layers * 8))
    nrm = lambda shape: jax.random.normal(next(keys), shape, jnp.float32) * 0.02
    p = {
        "word_emb": nrm((vocab, hidden)),
        "pos_emb": nrm((max_pos, hidden)),
        "type_emb": nrm((2, hidden)),
        "emb_ln_g": jnp.ones((hidden,), jnp.float32),
        "emb_ln_b": jnp.zeros((hidden,), jnp.float32),
    }
    per_layer = []
    for _ in range(layers):
        wq, wk, wv = nrm((hidden, hidden)), nrm((hidden, hidden)), nrm((hidden, hidden))
        lyr = {
            "wqkv": jnp.concatenate([wq, wk, wv], axis=1),          # [H, 3H] fused
            "bqkv": jnp.zeros((3 * hidden,), jnp.float32),
            "wo": nrm((hidden, hidden)), "bo": jnp.zeros((hidden,), jnp.float32),
            "ln1_g": jnp.ones((hidden,), jnp.float32), "ln1_b": jnp.zeros((hidden,), jnp.float32),
            "w1": nrm((hidden, inter)), "b1": jnp.zeros((inter,), jnp.float32),
            "w2": nrm((inter, hidden)), "b2": jnp.zeros((hidden,), jnp.float32),
            "ln2_g": jnp.ones((hidden,), jnp.float32), "ln2_b": jnp.zeros((hidden,), jnp.float32),
        }
        per_layer.append(lyr)
    # stack per-layer params on a leading axis for lax.scan
    p["layers"] = jax.tree_util.tree_map(lambda *xs: jnp.stack(xs, axis=0), *per_layer)
    return p


def encoder_for_rag_forward(params, input_ids, attention_mask, *, heads):
    """input_ids, attention_mask: [1, S] -> last_hidden_state.squeeze(0): [S, H]"""
    assert input_ids.shape[0] == 1, "RAG encoder squeezes batch dim; batch must be 1"
    S = input_ids.shape[1]

    ids = input_ids[0]
    # embedding gather is glue (plain JAX); add + LayerNorm fused in Pallas
    word = jnp.take(params["word_emb"], ids, axis=0)
    h = embed_layer_norm(word, params["pos_emb"][:S], params["type_emb"][0],
                         params["emb_ln_g"], params["emb_ln_b"])

    # additive attention mask: 0 where attended, -1e9 where masked (kept f32)
    mask_add = ((1.0 - attention_mask[0].astype(jnp.float32)) * -1e9).reshape(1, S)

    def layer_fn(h, lp):
        # fused QKV projection: one tiled matmul -> [S, 3H]
        qkv = linear(h, lp["wqkv"], lp["bqkv"])
        # all-heads attention straight from the fused QKV tensor -> [S, H]
        ctx = multi_head_attention(qkv, mask_add, heads)
        # output projection fused with bias + residual + LayerNorm
        h = linear_residual_ln(ctx, lp["wo"], lp["bo"], h, lp["ln1_g"], lp["ln1_b"])
        # FFN: up-proj with GELU epilogue, down-proj fused with residual + LN
        ff = linear(h, lp["w1"], lp["b1"], activation="gelu")
        h = linear_residual_ln(ff, lp["w2"], lp["b2"], h, lp["ln2_g"], lp["ln2_b"])
        return h, None

    h, _ = jax.lax.scan(layer_fn, h, params["layers"])
    return h  # == outputs.hidden_states[-1].squeeze(0)


# ----------------------------------------------------------------------------
# main
# ----------------------------------------------------------------------------
if __name__ == "__main__":
    VOCAB, MAX_POS = 64, 16
    SEQ, HIDDEN, HEADS, INTER, LAYERS = 8, 32, 4, 64, 2

    key = jax.random.PRNGKey(0)
    k_ids, k_params = jax.random.split(key)

    input_ids = jax.random.randint(k_ids, (1, SEQ), 0, VOCAB, dtype=jnp.int32)
    attention_mask = jnp.array([[1, 1, 1, 1, 1, 1, 0, 0]], dtype=jnp.int32)

    params = init_params(k_params, vocab=VOCAB, max_pos=MAX_POS, hidden=HIDDEN,
                         heads=HEADS, inter=INTER, layers=LAYERS)

    fwd = jax.jit(functools.partial(encoder_for_rag_forward, heads=HEADS))
    out = fwd(params, input_ids, attention_mask)
    out = jax.block_until_ready(out)
    assert out.shape == (SEQ, HIDDEN) and out.dtype == jnp.float32
    print("KERNEL_OK")
</pallas_src>

<mosaic_0001>
module attributes {stable_mosaic.version = 11 : i64} {
  func.func @_mha_kernel(%arg0: i32, %arg1: memref<8x96xf32, #tpu.memory_space<vmem>>, %arg2: memref<8x96xf32, #tpu.memory_space<vmem>>, %arg3: memref<1x8xf32, #tpu.memory_space<vmem>>, %arg4: memref<8x32xf32, #tpu.memory_space<vmem>>) attributes {dimension_semantics = [#tpu.dimension_semantics<parallel>], iteration_bounds = array<i64: 1>, scalar_prefetch = 0 : i64, scratch_operands = 0 : i64, tpu.core_type = #tpu.core_type<tc>, window_params = [{transform_indices = @transform_0, window_bounds = array<i64: 8, 96>}, {pipeline_mode = #tpu.pipeline_mode<synchronous>, transform_indices = @transform_1, window_bounds = array<i64: 8, 96>}, {pipeline_mode = #tpu.pipeline_mode<synchronous>, transform_indices = @transform_2, window_bounds = array<i64: 1, 8>}, {transform_indices = @transform_3, window_bounds = array<i64: 8, 32>}]} {
    %c0 = arith.constant 0 : index
    %c0_0 = arith.constant 0 : index
    %0 = vector.load %arg3[%c0, %c0_0] : memref<1x8xf32, #tpu.memory_space<vmem>>, vector<1x8xf32>
    %c0_1 = arith.constant 0 : index
    %c0_2 = arith.constant 0 : index
    %1 = vector.load %arg1[%c0_1, %c0_2] : memref<8x96xf32, #tpu.memory_space<vmem>>, vector<8x8xf32>
    %cst = arith.constant 0.353553385 : f32
    %2 = vector.broadcast %cst : f32 to vector<8x8xf32>
    %3 = arith.mulf %1, %2 : vector<8x8xf32>
    %c0_3 = arith.constant 0 : index
    %c32 = arith.constant 32 : index
    %4 = vector.load %arg2[%c0_3, %c32] : memref<8x96xf32, #tpu.memory_space<vmem>>, vector<8x8xf32>
    %c0_4 = arith.constant 0 : index
    %c64 = arith.constant 64 : index
    %5 = vector.load %arg2[%c0_4, %c64] : memref<8x96xf32, #tpu.memory_space<vmem>>, vector<8x8xf32>
    %cst_5 = arith.constant dense<0.000000e+00> : vector<8x8xf32>
    %6 = tpu.matmul %3, %4, %cst_5 {dimension_numbers = #tpu.dot_dimension_numbers<[1], [1], [0], [0], [0, 0, 1, 0], [], []>} : vector<8x8xf32>, vector<8x8xf32>, vector<8x8xf32> -> vector<8x8xf32>
    %7 = vector.broadcast %0 : vector<1x8xf32> to vector<8x8xf32>
    %8 = arith.addf %6, %7 : vector<8x8xf32>
    %cst_6 = arith.constant dense<0xFF800000> : vector<8xf32>
    %9 = vector.multi_reduction <maximumf>, %8, %cst_6 [1] : vector<8x8xf32> to vector<8xf32>
    %10 = vector.shape_cast %9 : vector<8xf32> to vector<8x1xf32>
    %11 = vector.broadcast %10 : vector<8x1xf32> to vector<8x8xf32>
    %12 = arith.subf %8, %11 : vector<8x8xf32>
    %13 = math.exp %12 : vector<8x8xf32>
    %cst_7 = arith.constant dense<0.000000e+00> : vector<8xf32>
    %14 = vector.multi_reduction <add>, %13, %cst_7 [1] : vector<8x8xf32> to vector<8xf32>
    %15 = vector.shape_cast %14 : vector<8xf32> to vector<8x1xf32>
    %16 = tpu.reciprocal %15 {approx = true} : vector<8x1xf32> -> vector<8x1xf32>
    %cst_8 = arith.constant dense<0.000000e+00> : vector<8x8xf32>
    %17 = tpu.matmul %13, %5, %cst_8 {dimension_numbers = #tpu.dot_dimension_numbers<[1], [0], [0], [1], [0, 0, 1, 1], [], []>} : vector<8x8xf32>, vector<8x8xf32>, vector<8x8xf32> -> vector<8x8xf32>
    %18 = vector.broadcast %16 : vector<8x1xf32> to vector<8x8xf32>
    %19 = arith.mulf %17, %18 : vector<8x8xf32>
    %c0_9 = arith.constant 0 : index
    %c8 = arith.constant 8 : index
    %20 = vector.load %arg1[%c0_9, %c8] : memref<8x96xf32, #tpu.memory_space<vmem>>, vector<8x8xf32>
    %cst_10 = arith.constant 0.353553385 : f32
    %21 = vector.broadcast %cst_10 : f32 to vector<8x8xf32>
    %22 = arith.mulf %20, %21 : vector<8x8xf32>
    %c0_11 = arith.constant 0 : index
    %c40 = arith.constant 40 : index
    %23 = vector.load %arg2[%c0_11, %c40] : memref<8x96xf32, #tpu.memory_space<vmem>>, vector<8x8xf32>
    %c0_12 = arith.constant 0 : index
    %c72 = arith.constant 72 : index
    %24 = vector.load %arg2[%c0_12, %c72] : memref<8x96xf32, #tpu.memory_space<vmem>>, vector<8x8xf32>
    %cst_13 = arith.constant dense<0.000000e+00> : vector<8x8xf32>
    %25 = tpu.matmul %22, %23, %cst_13 {dimension_numbers = #tpu.dot_dimension_numbers<[1], [1], [0], [0], [0, 0, 1, 0], [], []>} : vector<8x8xf32>, vector<8x8xf32>, vector<8x8xf32> -> vector<8x8xf32>
    %26 = vector.broadcast %0 : vector<1x8xf32> to vector<8x8xf32>
    %27 = arith.addf %25, %26 : vector<8x8xf32>
    %cst_14 = arith.constant dense<0xFF800000> : vector<8xf32>
    %28 = vector.multi_reduction <maximumf>, %27, %cst_14 [1] : vector<8x8xf32> to vector<8xf32>
    %29 = vector.shape_cast %28 : vector<8xf32> to vector<8x1xf32>
    %30 = vector.broadcast %29 : vector<8x1xf32> to vector<8x8xf32>
    %31 = arith.subf %27, %30 : vector<8x8xf32>
    %32 = math.exp %31 : vector<8x8xf32>
    %cst_15 = arith.constant dense<0.000000e+00> : vector<8xf32>
    %33 = vector.multi_reduction <add>, %32, %cst_15 [1] : vector<8x8xf32> to vector<8xf32>
    %34 = vector.shape_cast %33 : vector<8xf32> to vector<8x1xf32>
    %35 = tpu.reciprocal %34 {approx = true} : vector<8x1xf32> -> vector<8x1xf32>
    %cst_16 = arith.constant dense<0.000000e+00> : vector<8x8xf32>
    %36 = tpu.matmul %32, %24, %cst_16 {dimension_numbers = #tpu.dot_dimension_numbers<[1], [0], [0], [1], [0, 0, 1, 1], [], []>} : vector<8x8xf32>, vector<8x8xf32>, vector<8x8xf32> -> vector<8x8xf32>
    %37 = vector.broadcast %35 : vector<8x1xf32> to vector<8x8xf32>
    %38 = arith.mulf %36, %37 : vector<8x8xf32>
    %c0_17 = arith.constant 0 : index
    %c16 = arith.constant 16 : index
    %39 = vector.load %arg1[%c0_17, %c16] : memref<8x96xf32, #tpu.memory_space<vmem>>, vector<8x8xf32>
    %cst_18 = arith.constant 0.353553385 : f32
    %40 = vector.broadcast %cst_18 : f32 to vector<8x8xf32>
    %41 = arith.mulf %39, %40 : vector<8x8xf32>
    %c0_19 = arith.constant 0 : index
    %c48 = arith.constant 48 : index
    %42 = vector.load %arg2[%c0_19, %c48] : memref<8x96xf32, #tpu.memory_space<vmem>>, vector<8x8xf32>
    %c0_20 = arith.constant 0 : index
    %c80 = arith.constant 80 : index
    %43 = vector.load %arg2[%c0_20, %c80] : memref<8x96xf32, #tpu.memory_space<vmem>>, vector<8x8xf32>
    %cst_21 = arith.constant dense<0.000000e+00> : vector<8x8xf32>
    %44 = tpu.matmul %41, %42, %cst_21 {dimension_numbers = #tpu.dot_dimension_numbers<[1], [1], [0], [0], [0, 0, 1, 0], [], []>} : vector<8x8xf32>, vector<8x8xf32>, vector<8x8xf32> -> vector<8x8xf32>
    %45 = vector.broadcast %0 : vector<1x8xf32> to vector<8x8xf32>
    %46 = arith.addf %44, %45 : vector<8x8xf32>
    %cst_22 = arith.constant dense<0xFF800000> : vector<8xf32>
    %47 = vector.multi_reduction <maximumf>, %46, %cst_22 [1] : vector<8x8xf32> to vector<8xf32>
    %48 = vector.shape_cast %47 : vector<8xf32> to vector<8x1xf32>
    %49 = vector.broadcast %48 : vector<8x1xf32> to vector<8x8xf32>
    %50 = arith.subf %46, %49 : vector<8x8xf32>
    %51 = math.exp %50 : vector<8x8xf32>
    %cst_23 = arith.constant dense<0.000000e+00> : vector<8xf32>
    %52 = vector.multi_reduction <add>, %51, %cst_23 [1] : vector<8x8xf32> to vector<8xf32>
    %53 = vector.shape_cast %52 : vector<8xf32> to vector<8x1xf32>
    %54 = tpu.reciprocal %53 {approx = true} : vector<8x1xf32> -> vector<8x1xf32>
    %cst_24 = arith.constant dense<0.000000e+00> : vector<8x8xf32>
    %55 = tpu.matmul %51, %43, %cst_24 {dimension_numbers = #tpu.dot_dimension_numbers<[1], [0], [0], [1], [0, 0, 1, 1], [], []>} : vector<8x8xf32>, vector<8x8xf32>, vector<8x8xf32> -> vector<8x8xf32>
    %56 = vector.broadcast %54 : vector<8x1xf32> to vector<8x8xf32>
    %57 = arith.mulf %55, %56 : vector<8x8xf32>
    %c0_25 = arith.constant 0 : index
    %c24 = arith.constant 24 : index
    %58 = vector.load %arg1[%c0_25, %c24] : memref<8x96xf32, #tpu.memory_space<vmem>>, vector<8x8xf32>
    %cst_26 = arith.constant 0.353553385 : f32
    %59 = vector.broadcast %cst_26 : f32 to vector<8x8xf32>
    %60 = arith.mulf %58, %59 : vector<8x8xf32>
    %c0_27 = arith.constant 0 : index
    %c56 = arith.constant 56 : index
    %61 = vector.load %arg2[%c0_27, %c56] : memref<8x96xf32, #tpu.memory_space<vmem>>, vector<8x8xf32>
    %c0_28 = arith.constant 0 : index
    %c88 = arith.constant 88 : index
    %62 = vector.load %arg2[%c0_28, %c88] : memref<8x96xf32, #tpu.memory_space<vmem>>, vector<8x8xf32>
    %cst_29 = arith.constant dense<0.000000e+00> : vector<8x8xf32>
    %63 = tpu.matmul %60, %61, %cst_29 {dimension_numbers = #tpu.dot_dimension_numbers<[1], [1], [0], [0], [0, 0, 1, 0], [], []>} : vector<8x8xf32>, vector<8x8xf32>, vector<8x8xf32> -> vector<8x8xf32>
    %64 = vector.broadcast %0 : vector<1x8xf32> to vector<8x8xf32>
    %65 = arith.addf %63, %64 : vector<8x8xf32>
    %cst_30 = arith.constant dense<0xFF800000> : vector<8xf32>
    %66 = vector.multi_reduction <maximumf>, %65, %cst_30 [1] : vector<8x8xf32> to vector<8xf32>
    %67 = vector.shape_cast %66 : vector<8xf32> to vector<8x1xf32>
    %68 = vector.broadcast %67 : vector<8x1xf32> to vector<8x8xf32>
    %69 = arith.subf %65, %68 : vector<8x8xf32>
    %70 = math.exp %69 : vector<8x8xf32>
    %cst_31 = arith.constant dense<0.000000e+00> : vector<8xf32>
    %71 = vector.multi_reduction <add>, %70, %cst_31 [1] : vector<8x8xf32> to vector<8xf32>
    %72 = vector.shape_cast %71 : vector<8xf32> to vector<8x1xf32>
    %73 = tpu.reciprocal %72 {approx = true} : vector<8x1xf32> -> vector<8x1xf32>
    %cst_32 = arith.constant dense<0.000000e+00> : vector<8x8xf32>
    %74 = tpu.matmul %70, %62, %cst_32 {dimension_numbers = #tpu.dot_dimension_numbers<[1], [0], [0], [1], [0, 0, 1, 1], [], []>} : vector<8x8xf32>, vector<8x8xf32>, vector<8x8xf32> -> vector<8x8xf32>
    %75 = vector.broadcast %73 : vector<8x1xf32> to vector<8x8xf32>
    %76 = arith.mulf %74, %75 : vector<8x8xf32>
    %77 = tpu.concatenate %19, %38, %57, %76 in 1 : vector<8x8xf32>, vector<8x8xf32>, vector<8x8xf32>, vector<8x8xf32> -> vector<8x32xf32>
    %c0_33 = arith.constant 0 : index
    %c0_34 = arith.constant 0 : index
    %78 = vector.load %arg4[%c0_33, %c0_34] : memref<8x32xf32, #tpu.memory_space<vmem>>, vector<8x32xf32>
    tpu.vector_store %arg4[%c0_33, %c0_34], %77 {strides = array<i32>} : memref<8x32xf32, #tpu.memory_space<vmem>>, vector<8x32xf32>,
    return
  }
  func.func @transform_0(%arg0: i32) -> (i32, i32) {
    %c0_i32 = arith.constant 0 : i32
    %c0_i32_0 = arith.constant 0 : i32
    return %arg0, %c0_i32 : i32, i32
  }
  func.func @transform_1(%arg0: i32) -> (i32, i32) {
    %c0_i32 = arith.constant 0 : i32
    %c0_i32_0 = arith.constant 0 : i32
    %c0_i32_1 = arith.constant 0 : i32
    return %c0_i32, %c0_i32_0 : i32, i32
  }
  func.func @transform_2(%arg0: i32) -> (i32, i32) {
    %c0_i32 = arith.constant 0 : i32
    %c0_i32_0 = arith.constant 0 : i32
    %c0_i32_1 = arith.constant 0 : i32
    return %c0_i32, %c0_i32_0 : i32, i32
  }
  func.func @transform_3(%arg0: i32) -> (i32, i32) {
    %c0_i32 = arith.constant 0 : i32
    %c0_i32_0 = arith.constant 0 : i32
    return %arg0, %c0_i32 : i32, i32
  }
}

module attributes {stable_mosaic.version = 11 : i64} {
  func.func @_embed_ln_kernel(%arg0: i32, %arg1: memref<8x32xf32, #tpu.memory_space<vmem>>, %arg2: memref<8x32xf32, #tpu.memory_space<vmem>>, %arg3: memref<1x32xf32, #tpu.memory_space<vmem>>, %arg4: memref<1x32xf32, #tpu.memory_space<vmem>>, %arg5: memref<1x32xf32, #tpu.memory_space<vmem>>, %arg6: memref<8x32xf32, #tpu.memory_space<vmem>>) attributes {dimension_semantics = [#tpu.dimension_semantics<parallel>], iteration_bounds = array<i64: 1>, scalar_prefetch = 0 : i64, scratch_operands = 0 : i64, tpu.core_type = #tpu.core_type<tc>, window_params = [{transform_indices = @transform_0, window_bounds = array<i64: 8, 32>}, {transform_indices = @transform_1, window_bounds = array<i64: 8, 32>}, {pipeline_mode = #tpu.pipeline_mode<synchronous>, transform_indices = @transform_2, window_bounds = array<i64: 1, 32>}, {pipeline_mode = #tpu.pipeline_mode<synchronous>, transform_indices = @transform_3, window_bounds = array<i64: 1, 32>}, {pipeline_mode = #tpu.pipeline_mode<synchronous>, transform_indices = @transform_4, window_bounds = array<i64: 1, 32>}, {transform_indices = @transform_5, window_bounds = array<i64: 8, 32>}]} {
    %c0 = arith.constant 0 : index
    %c0_0 = arith.constant 0 : index
    %0 = vector.load %arg1[%c0, %c0_0] : memref<8x32xf32, #tpu.memory_space<vmem>>, vector<8x32xf32>
    %c0_1 = arith.constant 0 : index
    %c0_2 = arith.constant 0 : index
    %1 = vector.load %arg2[%c0_1, %c0_2] : memref<8x32xf32, #tpu.memory_space<vmem>>, vector<8x32xf32>
    %2 = arith.addf %0, %1 : vector<8x32xf32>
    %c0_3 = arith.constant 0 : index
    %c0_4 = arith.constant 0 : index
    %3 = vector.load %arg3[%c0_3, %c0_4] : memref<1x32xf32, #tpu.memory_space<vmem>>, vector<1x32xf32>
    %4 = vector.broadcast %3 : vector<1x32xf32> to vector<8x32xf32>
    %5 = arith.addf %2, %4 : vector<8x32xf32>
    %cst = arith.constant dense<0.000000e+00> : vector<8xf32>
    %6 = vector.multi_reduction <add>, %5, %cst [1] : vector<8x32xf32> to vector<8xf32>
    %7 = vector.shape_cast %6 : vector<8xf32> to vector<8x1xf32>
    %cst_5 = arith.constant 3.200000e+01 : f32
    %8 = vector.broadcast %cst_5 : f32 to vector<8x1xf32>
    %9 = arith.divf %7, %8 : vector<8x1xf32>
    %10 = vector.broadcast %9 : vector<8x1xf32> to vector<8x32xf32>
    %11 = arith.subf %5, %10 : vector<8x32xf32>
    %12 = arith.mulf %11, %11 : vector<8x32xf32>
    %cst_6 = arith.constant dense<0.000000e+00> : vector<8xf32>
    %13 = vector.multi_reduction <add>, %12, %cst_6 [1] : vector<8x32xf32> to vector<8xf32>
    %14 = vector.shape_cast %13 : vector<8xf32> to vector<8x1xf32>
    %cst_7 = arith.constant 3.200000e+01 : f32
    %15 = vector.broadcast %cst_7 : f32 to vector<8x1xf32>
    %16 = arith.divf %14, %15 : vector<8x1xf32>
    %17 = vector.broadcast %9 : vector<8x1xf32> to vector<8x32xf32>
    %18 = arith.subf %5, %17 : vector<8x32xf32>
    %cst_8 = arith.constant 9.99999996E-13 : f32
    %19 = vector.broadcast %cst_8 : f32 to vector<8x1xf32>
    %20 = arith.addf %16, %19 : vector<8x1xf32>
    %21 = math.rsqrt %20 : vector<8x1xf32>
    %22 = vector.broadcast %21 : vector<8x1xf32> to vector<8x32xf32>
    %23 = arith.mulf %18, %22 : vector<8x32xf32>
    %c0_9 = arith.constant 0 : index
    %c0_10 = arith.constant 0 : index
    %24 = vector.load %arg4[%c0_9, %c0_10] : memref<1x32xf32, #tpu.memory_space<vmem>>, vector<1x32xf32>
    %25 = vector.broadcast %24 : vector<1x32xf32> to vector<8x32xf32>
    %26 = arith.mulf %23, %25 : vector<8x32xf32>
    %c0_11 = arith.constant 0 : index
    %c0_12 = arith.constant 0 : index
    %27 = vector.load %arg5[%c0_11, %c0_12] : memref<1x32xf32, #tpu.memory_space<vmem>>, vector<1x32xf32>
    %28 = vector.broadcast %27 : vector<1x32xf32> to vector<8x32xf32>
    %29 = arith.addf %26, %28 : vector<8x32xf32>
    %c0_13 = arith.constant 0 : index
    %c0_14 = arith.constant 0 : index
    %30 = vector.load %arg6[%c0_13, %c0_14] : memref<8x32xf32, #tpu.memory_space<vmem>>, vector<8x32xf32>
    tpu.vector_store %arg6[%c0_13, %c0_14], %29 {strides = array<i32>} : memref<8x32xf32, #tpu.memory_space<vmem>>, vector<8x32xf32>,
    return
  }
  func.func @transform_0(%arg0: i32) -> (i32, i32) {
    %c0_i32 = arith.constant 0 : i32
    %c0_i32_0 = arith.constant 0 : i32
    return %arg0, %c0_i32 : i32, i32
  }
  func.func @transform_1(%arg0: i32) -> (i32, i32) {
    %c0_i32 = arith.constant 0 : i32
    %c0_i32_0 = arith.constant 0 : i32
    return %arg0, %c0_i32 : i32, i32
  }
  func.func @transform_2(%arg0: i32) -> (i32, i32) {
    %c0_i32 = arith.constant 0 : i32
    %c0_i32_0 = arith.constant 0 : i32
    %c0_i32_1 = arith.constant 0 : i32
    return %c0_i32, %c0_i32_0 : i32, i32
  }
  func.func @transform_3(%arg0: i32) -> (i32, i32) {
    %c0_i32 = arith.constant 0 : i32
    %c0_i32_0 = arith.constant 0 : i32
    %c0_i32_1 = arith.constant 0 : i32
    return %c0_i32, %c0_i32_0 : i32, i32
  }
  func.func @transform_4(%arg0: i32) -> (i32, i32) {
    %c0_i32 = arith.constant 0 : i32
    %c0_i32_0 = arith.constant 0 : i32
    %c0_i32_1 = arith.constant 0 : i32
    return %c0_i32, %c0_i32_0 : i32, i32
  }
  func.func @transform_5(%arg0: i32) -> (i32, i32) {
    %c0_i32 = arith.constant 0 : i32
    %c0_i32_0 = arith.constant 0 : i32
    return %arg0, %c0_i32 : i32, i32
  }
}

module attributes {stable_mosaic.version = 11 : i64} {
  func.func @_matmul_kernel(%arg0: i32, %arg1: i32, %arg2: i32, %arg3: memref<8x32xf32, #tpu.memory_space<vmem>>, %arg4: memref<32x96xf32, #tpu.memory_space<vmem>>, %arg5: memref<1x96xf32, #tpu.memory_space<vmem>>, %arg6: memref<8x96xf32, #tpu.memory_space<vmem>>, %arg7: memref<8x96xf32, #tpu.memory_space<vmem>>) attributes {dimension_semantics = [#tpu.dimension_semantics<parallel>, #tpu.dimension_semantics<parallel>, #tpu.dimension_semantics<arbitrary>], iteration_bounds = array<i64: 1, 1, 1>, scalar_prefetch = 0 : i64, scratch_operands = 1 : i64, tpu.core_type = #tpu.core_type<tc>, window_params = [{transform_indices = @transform_0, window_bounds = array<i64: 8, 32>}, {transform_indices = @transform_1, window_bounds = array<i64: 32, 96>}, {transform_indices = @transform_2, window_bounds = array<i64: 1, 96>}, {transform_indices = @transform_3, window_bounds = array<i64: 8, 96>}]} {
    %c0_i32 = arith.constant 0 : i32
    %0 = arith.cmpi eq, %arg2, %c0_i32 : i32
    %1 = arith.extui %0 : i1 to i32
    %c0_i32_0 = arith.constant 0 : i32
    %2 = arith.cmpi ne, %1, %c0_i32_0 : i32
    scf.if %2 {
      %cst_10 = arith.constant 0.000000e+00 : f32
      %12 = vector.broadcast %cst_10 : f32 to vector<8x96xf32>
      %c0_11 = arith.constant 0 : index
      %c0_12 = arith.constant 0 : index
      %13 = vector.load %arg7[%c0_11, %c0_12] : memref<8x96xf32, #tpu.memory_space<vmem>>, vector<8x96xf32>
      tpu.vector_store %arg7[%c0_11, %c0_12], %12 {strides = array<i32>} : memref<8x96xf32, #tpu.memory_space<vmem>>, vector<8x96xf32>,
    } else {
    }
    %c0 = arith.constant 0 : index
    %c0_1 = arith.constant 0 : index
    %3 = vector.load %arg7[%c0, %c0_1] : memref<8x96xf32, #tpu.memory_space<vmem>>, vector<8x96xf32>
    %c0_2 = arith.constant 0 : index
    %c0_3 = arith.constant 0 : index
    %4 = vector.load %arg3[%c0_2, %c0_3] : memref<8x32xf32, #tpu.memory_space<vmem>>, vector<8x32xf32>
    %c0_4 = arith.constant 0 : index
    %c0_5 = arith.constant 0 : index
    %5 = vector.load %arg4[%c0_4, %c0_5] : memref<32x96xf32, #tpu.memory_space<vmem>>, vector<32x96xf32>
    %cst = arith.constant dense<0.000000e+00> : vector<8x96xf32>
    %6 = tpu.matmul %4, %5, %cst {dimension_numbers = #tpu.dot_dimension_numbers<[1], [0], [0], [1], [0, 0, 1, 1], [], []>} : vector<8x32xf32>, vector<32x96xf32>, vector<8x96xf32> -> vector<8x96xf32>
    %7 = arith.addf %3, %6 : vector<8x96xf32>
    %c0_6 = arith.constant 0 : index
    %c0_7 = arith.constant 0 : index
    %8 = vector.load %arg7[%c0_6, %c0_7] : memref<8x96xf32, #tpu.memory_space<vmem>>, vector<8x96xf32>
    tpu.vector_store %arg7[%c0_6, %c0_7], %7 {strides = array<i32>} : memref<8x96xf32, #tpu.memory_space<vmem>>, vector<8x96xf32>,
    %c0_i32_8 = arith.constant 0 : i32
    %9 = arith.cmpi eq, %arg2, %c0_i32_8 : i32
    %10 = arith.extui %9 : i1 to i32
    %c0_i32_9 = arith.constant 0 : i32
    %11 = arith.cmpi ne, %10, %c0_i32_9 : i32
    scf.if %11 {
      %c0_10 = arith.constant 0 : index
      %c0_11 = arith.constant 0 : index
      %12 = vector.load %arg7[%c0_10, %c0_11] : memref<8x96xf32, #tpu.memory_space<vmem>>, vector<8x96xf32>
      %c0_12 = arith.constant 0 : index
      %c0_13 = arith.constant 0 : index
      %13 = vector.load %arg5[%c0_12, %c0_13] : memref<1x96xf32, #tpu.memory_space<vmem>>, vector<1x96xf32>
      %14 = vector.broadcast %13 : vector<1x96xf32> to vector<8x96xf32>
      %15 = arith.addf %12, %14 : vector<8x96xf32>
      %c0_14 = arith.constant 0 : index
      %c0_15 = arith.constant 0 : index
      %16 = vector.load %arg6[%c0_14, %c0_15] : memref<8x96xf32, #tpu.memory_space<vmem>>, vector<8x96xf32>
      tpu.vector_store %arg6[%c0_14, %c0_15], %15 {strides = array<i32>} : memref<8x96xf32, #tpu.memory_space<vmem>>, vector<8x96xf32>,
    } else {
    }
    return
  }
  func.func @transform_0(%arg0: i32, %arg1: i32, %arg2: i32) -> (i32, i32) {
    %c0_i32 = arith.constant 0 : i32
    return %arg0, %arg2 : i32, i32
  }
  func.func @transform_1(%arg0: i32, %arg1: i32, %arg2: i32) -> (i32, i32) {
    %c0_i32 = arith.constant 0 : i32
    return %arg2, %arg1 : i32, i32
  }
  func.func @transform_2(%arg0: i32, %arg1: i32, %arg2: i32) -> (i32, i32) {
    %c0_i32 = arith.constant 0 : i32
    %c0_i32_0 = arith.constant 0 : i32
    return %c0_i32, %arg1 : i32, i32
  }
  func.func @transform_3(%arg0: i32, %arg1: i32, %arg2: i32) -> (i32, i32) {
    %c0_i32 = arith.constant 0 : i32
    return %arg0, %arg1 : i32, i32
  }
}

module attributes {stable_mosaic.version = 11 : i64} {
  func.func @_matmul_res_ln_kernel(%arg0: i32, %arg1: i32, %arg2: memref<8x32xf32, #tpu.memory_space<vmem>>, %arg3: memref<32x32xf32, #tpu.memory_space<vmem>>, %arg4: memref<1x32xf32, #tpu.memory_space<vmem>>, %arg5: memref<8x32xf32, #tpu.memory_space<vmem>>, %arg6: memref<1x32xf32, #tpu.memory_space<vmem>>, %arg7: memref<1x32xf32, #tpu.memory_space<vmem>>, %arg8: memref<8x32xf32, #tpu.memory_space<vmem>>, %arg9: memref<8x32xf32, #tpu.memory_space<vmem>>) attributes {dimension_semantics = [#tpu.dimension_semantics<parallel>, #tpu.dimension_semantics<arbitrary>], iteration_bounds = array<i64: 1, 1>, scalar_prefetch = 0 : i64, scratch_operands = 1 : i64, tpu.core_type = #tpu.core_type<tc>, window_params = [{transform_indices = @transform_0, window_bounds = array<i64: 8, 32>}, {transform_indices = @transform_1, window_bounds = array<i64: 32, 32>}, {pipeline_mode = #tpu.pipeline_mode<synchronous>, transform_indices = @transform_2, window_bounds = array<i64: 1, 32>}, {transform_indices = @transform_3, window_bounds = array<i64: 8, 32>}, {pipeline_mode = #tpu.pipeline_mode<synchronous>, transform_indices = @transform_4, window_bounds = array<i64: 1, 32>}, {pipeline_mode = #tpu.pipeline_mode<synchronous>, transform_indices = @transform_5, window_bounds = array<i64: 1, 32>}, {transform_indices = @transform_6, window_bounds = array<i64: 8, 32>}]} {
    %c0_i32 = arith.constant 0 : i32
    %0 = arith.cmpi eq, %arg1, %c0_i32 : i32
    %1 = arith.extui %0 : i1 to i32
    %c0_i32_0 = arith.constant 0 : i32
    %2 = arith.cmpi ne, %1, %c0_i32_0 : i32
    scf.if %2 {
      %cst_10 = arith.constant 0.000000e+00 : f32
      %12 = vector.broadcast %cst_10 : f32 to vector<8x32xf32>
      %c0_11 = arith.constant 0 : index
      %c0_12 = arith.constant 0 : index
      %13 = vector.load %arg9[%c0_11, %c0_12] : memref<8x32xf32, #tpu.memory_space<vmem>>, vector<8x32xf32>
      tpu.vector_store %arg9[%c0_11, %c0_12], %12 {strides = array<i32>} : memref<8x32xf32, #tpu.memory_space<vmem>>, vector<8x32xf32>,
    } else {
    }
    %c0 = arith.constant 0 : index
    %c0_1 = arith.constant 0 : index
    %3 = vector.load %arg9[%c0, %c0_1] : memref<8x32xf32, #tpu.memory_space<vmem>>, vector<8x32xf32>
    %c0_2 = arith.constant 0 : index
    %c0_3 = arith.constant 0 : index
    %4 = vector.load %arg2[%c0_2, %c0_3] : memref<8x32xf32, #tpu.memory_space<vmem>>, vector<8x32xf32>
    %c0_4 = arith.constant 0 : index
    %c0_5 = arith.constant 0 : index
    %5 = vector.load %arg3[%c0_4, %c0_5] : memref<32x32xf32, #tpu.memory_space<vmem>>, vector<32x32xf32>
    %cst = arith.constant dense<0.000000e+00> : vector<8x32xf32>
    %6 = tpu.matmul %4, %5, %cst {dimension_numbers = #tpu.dot_dimension_numbers<[1], [0], [0], [1], [0, 0, 1, 1], [], []>} : vector<8x32xf32>, vector<32x32xf32>, vector<8x32xf32> -> vector<8x32xf32>
    %7 = arith.addf %3, %6 : vector<8x32xf32>
    %c0_6 = arith.constant 0 : index
    %c0_7 = arith.constant 0 : index
    %8 = vector.load %arg9[%c0_6, %c0_7] : memref<8x32xf32, #tpu.memory_space<vmem>>, vector<8x32xf32>
    tpu.vector_store %arg9[%c0_6, %c0_7], %7 {strides = array<i32>} : memref<8x32xf32, #tpu.memory_space<vmem>>, vector<8x32xf32>,
    %c0_i32_8 = arith.constant 0 : i32
    %9 = arith.cmpi eq, %arg1, %c0_i32_8 : i32
    %10 = arith.extui %9 : i1 to i32
    %c0_i32_9 = arith.constant 0 : i32
    %11 = arith.cmpi ne, %10, %c0_i32_9 : i32
    scf.if %11 {
      %c0_10 = arith.constant 0 : index
      %c0_11 = arith.constant 0 : index
      %12 = vector.load %arg9[%c0_10, %c0_11] : memref<8x32xf32, #tpu.memory_space<vmem>>, vector<8x32xf32>
      %c0_12 = arith.constant 0 : index
      %c0_13 = arith.constant 0 : index
      %13 = vector.load %arg4[%c0_12, %c0_13] : memref<1x32xf32, #tpu.memory_space<vmem>>, vector<1x32xf32>
      %14 = vector.broadcast %13 : vector<1x32xf32> to vector<8x32xf32>
      %15 = arith.addf %12, %14 : vector<8x32xf32>
      %c0_14 = arith.constant 0 : index
      %c0_15 = arith.constant 0 : index
      %16 = vector.load %arg5[%c0_14, %c0_15] : memref<8x32xf32, #tpu.memory_space<vmem>>, vector<8x32xf32>
      %17 = arith.addf %15, %16 : vector<8x32xf32>
      %cst_16 = arith.constant dense<0.000000e+00> : vector<8xf32>
      %18 = vector.multi_reduction <add>, %17, %cst_16 [1] : vector<8x32xf32> to vector<8xf32>
      %19 = vector.shape_cast %18 : vector<8xf32> to vector<8x1xf32>
      %cst_17 = arith.constant 3.200000e+01 : f32
      %20 = vector.broadcast %cst_17 : f32 to vector<8x1xf32>
      %21 = arith.divf %19, %20 : vector<8x1xf32>
      %22 = vector.broadcast %21 : vector<8x1xf32> to vector<8x32xf32>
      %23 = arith.subf %17, %22 : vector<8x32xf32>
      %24 = arith.mulf %23, %23 : vector<8x32xf32>
      %cst_18 = arith.constant dense<0.000000e+00> : vector<8xf32>
      %25 = vector.multi_reduction <add>, %24, %cst_18 [1] : vector<8x32xf32> to vector<8xf32>
      %26 = vector.shape_cast %25 : vector<8xf32> to vector<8x1xf32>
      %cst_19 = arith.constant 3.200000e+01 : f32
      %27 = vector.broadcast %cst_19 : f32 to vector<8x1xf32>
      %28 = arith.divf %26, %27 : vector<8x1xf32>
      %29 = vector.broadcast %21 : vector<8x1xf32> to vector<8x32xf32>
      %30 = arith.subf %17, %29 : vector<8x32xf32>
      %cst_20 = arith.constant 9.99999996E-13 : f32
      %31 = vector.broadcast %cst_20 : f32 to vector<8x1xf32>
      %32 = arith.addf %28, %31 : vector<8x1xf32>
      %33 = math.rsqrt %32 : vector<8x1xf32>
      %34 = vector.broadcast %33 : vector<8x1xf32> to vector<8x32xf32>
      %35 = arith.mulf %30, %34 : vector<8x32xf32>
      %c0_21 = arith.constant 0 : index
      %c0_22 = arith.constant 0 : index
      %36 = vector.load %arg6[%c0_21, %c0_22] : memref<1x32xf32, #tpu.memory_space<vmem>>, vector<1x32xf32>
      %37 = vector.broadcast %36 : vector<1x32xf32> to vector<8x32xf32>
      %38 = arith.mulf %35, %37 : vector<8x32xf32>
      %c0_23 = arith.constant 0 : index
      %c0_24 = arith.constant 0 : index
      %39 = vector.load %arg7[%c0_23, %c0_24] : memref<1x32xf32, #tpu.memory_space<vmem>>, vector<1x32xf32>
      %40 = vector.broadcast %39 : vector<1x32xf32> to vector<8x32xf32>
      %41 = arith.addf %38, %40 : vector<8x32xf32>
      %c0_25 = arith.constant 0 : index
      %c0_26 = arith.constant 0 : index
      %42 = vector.load %arg8[%c0_25, %c0_26] : memref<8x32xf32, #tpu.memory_space<vmem>>, vector<8x32xf32>
      tpu.vector_store %arg8[%c0_25, %c0_26], %41 {strides = array<i32>} : memref<8x32xf32, #tpu.memory_space<vmem>>, vector<8x32xf32>,
    } else {
    }
    return
  }
  func.func @transform_0(%arg0: i32, %arg1: i32) -> (i32, i32) {
    %c0_i32 = arith.constant 0 : i32
    return %arg0, %arg1 : i32, i32
  }
  func.func @transform_1(%arg0: i32, %arg1: i32) -> (i32, i32) {
    %c0_i32 = arith.constant 0 : i32
    %c0_i32_0 = arith.constant 0 : i32
    return %arg1, %c0_i32 : i32, i32
  }
  func.func @transform_2(%arg0: i32, %arg1: i32) -> (i32, i32) {
    %c0_i32 = arith.constant 0 : i32
    %c0_i32_0 = arith.constant 0 : i32
    %c0_i32_1 = arith.constant 0 : i32
    return %c0_i32, %c0_i32_0 : i32, i32
  }
  func.func @transform_3(%arg0: i32, %arg1: i32) -> (i32, i32) {
    %c0_i32 = arith.constant 0 : i32
    %c0_i32_0 = arith.constant 0 : i32
    return %arg0, %c0_i32 : i32, i32
  }
  func.func @transform_4(%arg0: i32, %arg1: i32) -> (i32, i32) {
    %c0_i32 = arith.constant 0 : i32
    %c0_i32_0 = arith.constant 0 : i32
    %c0_i32_1 = arith.constant 0 : i32
    return %c0_i32, %c0_i32_0 : i32, i32
  }
  func.func @transform_5(%arg0: i32, %arg1: i32) -> (i32, i32) {
    %c0_i32 = arith.constant 0 : i32
    %c0_i32_0 = arith.constant 0 : i32
    %c0_i32_1 = arith.constant 0 : i32
    return %c0_i32, %c0_i32_0 : i32, i32
  }
  func.func @transform_6(%arg0: i32, %arg1: i32) -> (i32, i32) {
    %c0_i32 = arith.constant 0 : i32
    %c0_i32_0 = arith.constant 0 : i32
    return %arg0, %c0_i32 : i32, i32
  }
}

module attributes {stable_mosaic.version = 11 : i64} {
  func.func @_matmul_res_ln_kernel(%arg0: i32, %arg1: i32, %arg2: memref<8x64xf32, #tpu.memory_space<vmem>>, %arg3: memref<64x32xf32, #tpu.memory_space<vmem>>, %arg4: memref<1x32xf32, #tpu.memory_space<vmem>>, %arg5: memref<8x32xf32, #tpu.memory_space<vmem>>, %arg6: memref<1x32xf32, #tpu.memory_space<vmem>>, %arg7: memref<1x32xf32, #tpu.memory_space<vmem>>, %arg8: memref<8x32xf32, #tpu.memory_space<vmem>>, %arg9: memref<8x32xf32, #tpu.memory_space<vmem>>) attributes {dimension_semantics = [#tpu.dimension_semantics<parallel>, #tpu.dimension_semantics<arbitrary>], iteration_bounds = array<i64: 1, 1>, scalar_prefetch = 0 : i64, scratch_operands = 1 : i64, tpu.core_type = #tpu.core_type<tc>, window_params = [{transform_indices = @transform_0, window_bounds = array<i64: 8, 64>}, {transform_indices = @transform_1, window_bounds = array<i64: 64, 32>}, {pipeline_mode = #tpu.pipeline_mode<synchronous>, transform_indices = @transform_2, window_bounds = array<i64: 1, 32>}, {transform_indices = @transform_3, window_bounds = array<i64: 8, 32>}, {pipeline_mode = #tpu.pipeline_mode<synchronous>, transform_indices = @transform_4, window_bounds = array<i64: 1, 32>}, {pipeline_mode = #tpu.pipeline_mode<synchronous>, transform_indices = @transform_5, window_bounds = array<i64: 1, 32>}, {transform_indices = @transform_6, window_bounds = array<i64: 8, 32>}]} {
    %c0_i32 = arith.constant 0 : i32
    %0 = arith.cmpi eq, %arg1, %c0_i32 : i32
    %1 = arith.extui %0 : i1 to i32
    %c0_i32_0 = arith.constant 0 : i32
    %2 = arith.cmpi ne, %1, %c0_i32_0 : i32
    scf.if %2 {
      %cst_10 = arith.constant 0.000000e+00 : f32
      %12 = vector.broadcast %cst_10 : f32 to vector<8x32xf32>
      %c0_11 = arith.constant 0 : index
      %c0_12 = arith.constant 0 : index
      %13 = vector.load %arg9[%c0_11, %c0_12] : memref<8x32xf32, #tpu.memory_space<vmem>>, vector<8x32xf32>
      tpu.vector_store %arg9[%c0_11, %c0_12], %12 {strides = array<i32>} : memref<8x32xf32, #tpu.memory_space<vmem>>, vector<8x32xf32>,
    } else {
    }
    %c0 = arith.constant 0 : index
    %c0_1 = arith.constant 0 : index
    %3 = vector.load %arg9[%c0, %c0_1] : memref<8x32xf32, #tpu.memory_space<vmem>>, vector<8x32xf32>
    %c0_2 = arith.constant 0 : index
    %c0_3 = arith.constant 0 : index
    %4 = vector.load %arg2[%c0_2, %c0_3] : memref<8x64xf32, #tpu.memory_space<vmem>>, vector<8x64xf32>
    %c0_4 = arith.constant 0 : index
    %c0_5 = arith.constant 0 : index
    %5 = vector.load %arg3[%c0_4, %c0_5] : memref<64x32xf32, #tpu.memory_space<vmem>>, vector<64x32xf32>
    %cst = arith.constant dense<0.000000e+00> : vector<8x32xf32>
    %6 = tpu.matmul %4, %5, %cst {dimension_numbers = #tpu.dot_dimension_numbers<[1], [0], [0], [1], [0, 0, 1, 1], [], []>} : vector<8x64xf32>, vector<64x32xf32>, vector<8x32xf32> -> vector<8x32xf32>
    %7 = arith.addf %3, %6 : vector<8x32xf32>
    %c0_6 = arith.constant 0 : index
    %c0_7 = arith.constant 0 : index
    %8 = vector.load %arg9[%c0_6, %c0_7] : memref<8x32xf32, #tpu.memory_space<vmem>>, vector<8x32xf32>
    tpu.vector_store %arg9[%c0_6, %c0_7], %7 {strides = array<i32>} : memref<8x32xf32, #tpu.memory_space<vmem>>, vector<8x32xf32>,
    %c0_i32_8 = arith.constant 0 : i32
    %9 = arith.cmpi eq, %arg1, %c0_i32_8 : i32
    %10 = arith.extui %9 : i1 to i32
    %c0_i32_9 = arith.constant 0 : i32
    %11 = arith.cmpi ne, %10, %c0_i32_9 : i32
    scf.if %11 {
      %c0_10 = arith.constant 0 : index
      %c0_11 = arith.constant 0 : index
      %12 = vector.load %arg9[%c0_10, %c0_11] : memref<8x32xf32, #tpu.memory_space<vmem>>, vector<8x32xf32>
      %c0_12 = arith.constant 0 : index
      %c0_13 = arith.constant 0 : index
      %13 = vector.load %arg4[%c0_12, %c0_13] : memref<1x32xf32, #tpu.memory_space<vmem>>, vector<1x32xf32>
      %14 = vector.broadcast %13 : vector<1x32xf32> to vector<8x32xf32>
      %15 = arith.addf %12, %14 : vector<8x32xf32>
      %c0_14 = arith.constant 0 : index
      %c0_15 = arith.constant 0 : index
      %16 = vector.load %arg5[%c0_14, %c0_15] : memref<8x32xf32, #tpu.memory_space<vmem>>, vector<8x32xf32>
      %17 = arith.addf %15, %16 : vector<8x32xf32>
      %cst_16 = arith.constant dense<0.000000e+00> : vector<8xf32>
      %18 = vector.multi_reduction <add>, %17, %cst_16 [1] : vector<8x32xf32> to vector<8xf32>
      %19 = vector.shape_cast %18 : vector<8xf32> to vector<8x1xf32>
      %cst_17 = arith.constant 3.200000e+01 : f32
      %20 = vector.broadcast %cst_17 : f32 to vector<8x1xf32>
      %21 = arith.divf %19, %20 : vector<8x1xf32>
      %22 = vector.broadcast %21 : vector<8x1xf32> to vector<8x32xf32>
      %23 = arith.subf %17, %22 : vector<8x32xf32>
      %24 = arith.mulf %23, %23 : vector<8x32xf32>
      %cst_18 = arith.constant dense<0.000000e+00> : vector<8xf32>
      %25 = vector.multi_reduction <add>, %24, %cst_18 [1] : vector<8x32xf32> to vector<8xf32>
      %26 = vector.shape_cast %25 : vector<8xf32> to vector<8x1xf32>
      %cst_19 = arith.constant 3.200000e+01 : f32
      %27 = vector.broadcast %cst_19 : f32 to vector<8x1xf32>
      %28 = arith.divf %26, %27 : vector<8x1xf32>
      %29 = vector.broadcast %21 : vector<8x1xf32> to vector<8x32xf32>
      %30 = arith.subf %17, %29 : vector<8x32xf32>
      %cst_20 = arith.constant 9.99999996E-13 : f32
      %31 = vector.broadcast %cst_20 : f32 to vector<8x1xf32>
      %32 = arith.addf %28, %31 : vector<8x1xf32>
      %33 = math.rsqrt %32 : vector<8x1xf32>
      %34 = vector.broadcast %33 : vector<8x1xf32> to vector<8x32xf32>
      %35 = arith.mulf %30, %34 : vector<8x32xf32>
      %c0_21 = arith.constant 0 : index
      %c0_22 = arith.constant 0 : index
      %36 = vector.load %arg6[%c0_21, %c0_22] : memref<1x32xf32, #tpu.memory_space<vmem>>, vector<1x32xf32>
      %37 = vector.broadcast %36 : vector<1x32xf32> to vector<8x32xf32>
      %38 = arith.mulf %35, %37 : vector<8x32xf32>
      %c0_23 = arith.constant 0 : index
      %c0_24 = arith.constant 0 : index
      %39 = vector.load %arg7[%c0_23, %c0_24] : memref<1x32xf32, #tpu.memory_space<vmem>>, vector<1x32xf32>
      %40 = vector.broadcast %39 : vector<1x32xf32> to vector<8x32xf32>
      %41 = arith.addf %38, %40 : vector<8x32xf32>
      %c0_25 = arith.constant 0 : index
      %c0_26 = arith.constant 0 : index
      %42 = vector.load %arg8[%c0_25, %c0_26] : memref<8x32xf32, #tpu.memory_space<vmem>>, vector<8x32xf32>
      tpu.vector_store %arg8[%c0_25, %c0_26], %41 {strides = array<i32>} : memref<8x32xf32, #tpu.memory_space<vmem>>, vector<8x32xf32>,
    } else {
    }
    return
  }
  func.func @transform_0(%arg0: i32, %arg1: i32) -> (i32, i32) {
    %c0_i32 = arith.constant 0 : i32
    return %arg0, %arg1 : i32, i32
  }
  func.func @transform_1(%arg0: i32, %arg1: i32) -> (i32, i32) {
    %c0_i32 = arith.constant 0 : i32
    %c0_i32_0 = arith.constant 0 : i32
    return %arg1, %c0_i32 : i32, i32
  }
  func.func @transform_2(%arg0: i32, %arg1: i32) -> (i32, i32) {
    %c0_i32 = arith.constant 0 : i32
    %c0_i32_0 = arith.constant 0 : i32
    %c0_i32_1 = arith.constant 0 : i32
    return %c0_i32, %c0_i32_0 : i32, i32
  }
  func.func @transform_3(%arg0: i32, %arg1: i32) -> (i32, i32) {
    %c0_i32 = arith.constant 0 : i32
    %c0_i32_0 = arith.constant 0 : i32
    return %arg0, %c0_i32 : i32, i32
  }
  func.func @transform_4(%arg0: i32, %arg1: i32) -> (i32, i32) {
    %c0_i32 = arith.constant 0 : i32
    %c0_i32_0 = arith.constant 0 : i32
    %c0_i32_1 = arith.constant 0 : i32
    return %c0_i32, %c0_i32_0 : i32, i32
  }
  func.func @transform_5(%arg0: i32, %arg1: i32) -> (i32, i32) {
    %c0_i32 = arith.constant 0 : i32
    %c0_i32_0 = arith.constant 0 : i32
    %c0_i32_1 = arith.constant 0 : i32
    return %c0_i32, %c0_i32_0 : i32, i32
  }
  func.func @transform_6(%arg0: i32, %arg1: i32) -> (i32, i32) {
    %c0_i32 = arith.constant 0 : i32
    %c0_i32_0 = arith.constant 0 : i32
    return %arg0, %c0_i32 : i32, i32
  }
}

module attributes {stable_mosaic.version = 11 : i64} {
  func.func @_matmul_kernel(%arg0: i32, %arg1: i32, %arg2: i32, %arg3: memref<8x32xf32, #tpu.memory_space<vmem>>, %arg4: memref<32x64xf32, #tpu.memory_space<vmem>>, %arg5: memref<1x64xf32, #tpu.memory_space<vmem>>, %arg6: memref<8x64xf32, #tpu.memory_space<vmem>>, %arg7: memref<8x64xf32, #tpu.memory_space<vmem>>) attributes {dimension_semantics = [#tpu.dimension_semantics<parallel>, #tpu.dimension_semantics<parallel>, #tpu.dimension_semantics<arbitrary>], iteration_bounds = array<i64: 1, 1, 1>, scalar_prefetch = 0 : i64, scratch_operands = 1 : i64, tpu.core_type = #tpu.core_type<tc>, window_params = [{transform_indices = @transform_0, window_bounds = array<i64: 8, 32>}, {transform_indices = @transform_1, window_bounds = array<i64: 32, 64>}, {transform_indices = @transform_2, window_bounds = array<i64: 1, 64>}, {transform_indices = @transform_3, window_bounds = array<i64: 8, 64>}]} {
    %c0_i32 = arith.constant 0 : i32
    %0 = arith.cmpi eq, %arg2, %c0_i32 : i32
    %1 = arith.extui %0 : i1 to i32
    %c0_i32_0 = arith.constant 0 : i32
    %2 = arith.cmpi ne, %1, %c0_i32_0 : i32
    scf.if %2 {
      %cst_10 = arith.constant 0.000000e+00 : f32
      %12 = vector.broadcast %cst_10 : f32 to vector<8x64xf32>
      %c0_11 = arith.constant 0 : index
      %c0_12 = arith.constant 0 : index
      %13 = vector.load %arg7[%c0_11, %c0_12] : memref<8x64xf32, #tpu.memory_space<vmem>>, vector<8x64xf32>
      tpu.vector_store %arg7[%c0_11, %c0_12], %12 {strides = array<i32>} : memref<8x64xf32, #tpu.memory_space<vmem>>, vector<8x64xf32>,
    } else {
    }
    %c0 = arith.constant 0 : index
    %c0_1 = arith.constant 0 : index
    %3 = vector.load %arg7[%c0, %c0_1] : memref<8x64xf32, #tpu.memory_space<vmem>>, vector<8x64xf32>
    %c0_2 = arith.constant 0 : index
    %c0_3 = arith.constant 0 : index
    %4 = vector.load %arg3[%c0_2, %c0_3] : memref<8x32xf32, #tpu.memory_space<vmem>>, vector<8x32xf32>
    %c0_4 = arith.constant 0 : index
    %c0_5 = arith.constant 0 : index
    %5 = vector.load %arg4[%c0_4, %c0_5] : memref<32x64xf32, #tpu.memory_space<vmem>>, vector<32x64xf32>
    %cst = arith.constant dense<0.000000e+00> : vector<8x64xf32>
    %6 = tpu.matmul %4, %5, %cst {dimension_numbers = #tpu.dot_dimension_numbers<[1], [0], [0], [1], [0, 0, 1, 1], [], []>} : vector<8x32xf32>, vector<32x64xf32>, vector<8x64xf32> -> vector<8x64xf32>
    %7 = arith.addf %3, %6 : vector<8x64xf32>
    %c0_6 = arith.constant 0 : index
    %c0_7 = arith.constant 0 : index
    %8 = vector.load %arg7[%c0_6, %c0_7] : memref<8x64xf32, #tpu.memory_space<vmem>>, vector<8x64xf32>
    tpu.vector_store %arg7[%c0_6, %c0_7], %7 {strides = array<i32>} : memref<8x64xf32, #tpu.memory_space<vmem>>, vector<8x64xf32>,
    %c0_i32_8 = arith.constant 0 : i32
    %9 = arith.cmpi eq, %arg2, %c0_i32_8 : i32
    %10 = arith.extui %9 : i1 to i32
    %c0_i32_9 = arith.constant 0 : i32
    %11 = arith.cmpi ne, %10, %c0_i32_9 : i32
    scf.if %11 {
      %c0_10 = arith.constant 0 : index
      %c0_11 = arith.constant 0 : index
      %12 = vector.load %arg7[%c0_10, %c0_11] : memref<8x64xf32, #tpu.memory_space<vmem>>, vector<8x64xf32>
      %c0_12 = arith.constant 0 : index
      %c0_13 = arith.constant 0 : index
      %13 = vector.load %arg5[%c0_12, %c0_13] : memref<1x64xf32, #tpu.memory_space<vmem>>, vector<1x64xf32>
      %14 = vector.broadcast %13 : vector<1x64xf32> to vector<8x64xf32>
      %15 = arith.addf %12, %14 : vector<8x64xf32>
      %cst_14 = arith.constant 5.000000e-01 : f32
      %16 = vector.broadcast %cst_14 : f32 to vector<8x64xf32>
      %17 = arith.mulf %16, %15 : vector<8x64xf32>
      %cst_15 = arith.constant 4.471500e-02 : f32
      %18 = vector.broadcast %cst_15 : f32 to vector<8x64xf32>
      %19 = arith.mulf %18, %15 : vector<8x64xf32>
      %20 = arith.mulf %19, %15 : vector<8x64xf32>
      %21 = arith.mulf %20, %15 : vector<8x64xf32>
      %22 = arith.addf %15, %21 : vector<8x64xf32>
      %cst_16 = arith.constant 0.797884583 : f32
      %23 = vector.broadcast %cst_16 : f32 to vector<8x64xf32>
      %24 = arith.mulf %23, %22 : vector<8x64xf32>
      %25 = math.tanh %24 : vector<8x64xf32>
      %cst_17 = arith.constant 1.000000e+00 : f32
      %26 = vector.broadcast %cst_17 : f32 to vector<8x64xf32>
      %27 = arith.addf %26, %25 : vector<8x64xf32>
      %28 = arith.mulf %17, %27 : vector<8x64xf32>
      %c0_18 = arith.constant 0 : index
      %c0_19 = arith.constant 0 : index
      %29 = vector.load %arg6[%c0_18, %c0_19] : memref<8x64xf32, #tpu.memory_space<vmem>>, vector<8x64xf32>
      tpu.vector_store %arg6[%c0_18, %c0_19], %28 {strides = array<i32>} : memref<8x64xf32, #tpu.memory_space<vmem>>, vector<8x64xf32>,
    } else {
    }
    return
  }
  func.func @transform_0(%arg0: i32, %arg1: i32, %arg2: i32) -> (i32, i32) {
    %c0_i32 = arith.constant 0 : i32
    return %arg0, %arg2 : i32, i32
  }
  func.func @transform_1(%arg0: i32, %arg1: i32, %arg2: i32) -> (i32, i32) {
    %c0_i32 = arith.constant 0 : i32
    return %arg2, %arg1 : i32, i32
  }
  func.func @transform_2(%arg0: i32, %arg1: i32, %arg2: i32) -> (i32, i32) {
    %c0_i32 = arith.constant 0 : i32
    %c0_i32_0 = arith.constant 0 : i32
    return %c0_i32, %arg1 : i32, i32
  }
  func.func @transform_3(%arg0: i32, %arg1: i32, %arg2: i32) -> (i32, i32) {
    %c0_i32 = arith.constant 0 : i32
    return %arg0, %arg1 : i32, i32
  }
}

</mosaic_0001>

<bundles_post_ra>
// kernel: encoder_for_rag_forward.1
= control target key start
LH: loop header
LB: loop body
LE: loop exit
PB: predicated region body
PF: predicated region fallthrough
CT: control target
= control target key end

     0   :  { %vm31_vm0 = vcmask 261120   ;;  %s123_s0 = inlined_call_operand.vmem [shape: f32[8,32], index: 0, kind: input, shape index: {}]   ;;  %s124_s1 = inlined_call_operand.vmem [shape: f32[8,32], index: 1, kind: input, shape index: {}]   ;;  %s125_s2 = inlined_call_operand.vmem [shape: f32[1,32], index: 2, kind: input, shape index: {}]   ;;  %s126_s3 = inlined_call_operand.vmem [shape: f32[1,32], index: 3, kind: input, shape index: {}]   ;;  %s127_s4 = inlined_call_operand.vmem [shape: f32[1,32], index: 4, kind: input, shape index: {}]   ;;  %s128_s5 = inlined_call_operand.vmem [shape: f32[8,32], index: 5, kind: output, shape index: {}]  }
   0x1   :  { %v20_v0 = vld [vmem:[%s123_s0] sm:$0xff] }
   0x2   :  { %v21_v1 = vld [vmem:[%s124_s1] sm:$0xff] }
   0x3   :  { %v67_v2 = vld [vmem:[%s125_s2] ss:$0 sm:$0xff]  ;;  %v22_v3 = vadd.f32 %v21_v1, %v20_v0 }
   0x4   :  { %v68_v15 = vld [vmem:[%s126_s3] ss:$0 sm:$0xff] }
   0x5   :  { %v30_v4 = vadd.f32 %v67_v2, %v22_v3  ;;  %v69_v17 = vld [vmem:[%s127_s4] ss:$0 sm:$0xff] }
   0x7   :  { %v32_v5 = vsel %vm31_vm0, %v30_v4, 0.0 }
   0x8   :  { %33 = vadd.xlane.f32.xlu0 %v32_v5 }
  0x91   :  { %v34_v6 = vpop.xlane.xlu0 %33 }
  0x92   :  { %v36_v7 = vmul.f32 0.03125, %v34_v6 }
  0x94   :  { %v37_v8 = vsub.f32 %v30_v4, %v36_v7 }
  0x96   :  { %v38_v9 = vmul.f32 %v37_v8, %v37_v8 }
  0x98   :  { %v39_v10 = vsel %vm31_vm0, %v38_v9, 0.0 }
  0x99   :  { %40 = vadd.xlane.f32.xlu0 %v39_v10 }
 0x122   :  { %v41_v11 = vpop.xlane.xlu0 %40 }
 0x123   :  { %v42_v12 = vmul.f32 0.03125, %v41_v11 }
 0x125   :  { %v43_v13 = vadd.f32 1e-12, %v42_v12 }
 0x127   :  { %70 = vrsqrt.f32 %v43_v13 }
 0x134   :  { %v71_v14 = vpop.eup %70 }
 0x135   :  { %v45_v16 = vmul.f32 %v71_v14, %v37_v8 }
 0x137   :  { %v53_v18 = vmul.f32 %v68_v15, %v45_v16 }
 0x139   :  { %v61_v19 = vadd.f32 %v69_v17, %v53_v18 }
 0x13b   :  { %62 = vst.msk [vmem:[%s128_s5] sm:$0xff] %vm31_vm0, %v61_v19 }

// kernel: closed_call.16
= control target key start
LH: loop header
LB: loop body
LE: loop exit
PB: predicated region body
PF: predicated region fallthrough
CT: control target
= control target key end

     0   :  { %vm18_vm0 = vcmask 785408   ;;  %v140_v0 = vmov 0.0   ;;  %vm141_vm1 = vmmov 0   ;;  %vm26_vm2 = vcmask 261120   ;;  %s186_s1 = inlined_call_operand.vmem [shape: f32[32,96], index: 1, kind: input, shape index: {}]   ;;  %s187_s0 = inlined_call_operand.vmem [shape: f32[8,32], index: 0, kind: input, shape index: {}]   ;;  %s188_s2 = inlined_call_operand.vmem [shape: f32[1,96], index: 2, kind: input, shape index: {}]   ;;  %s189_s3 = inlined_call_operand.vmem [shape: f32[8,96], index: 3, kind: output, shape index: {}]  }
   0x1   :  { %127 = vmatprep.subr.mxu0 %v140_v0  ;;  %v25_v1 = vld [vmem:[%s186_s1 + $0x18] sm:$0xff]  ;;  %v24_v2 = vld [vmem:[%s186_s1 + $0x10] sm:$0xff]  ;;  %135 = vmatprep.mubr.msk.f32.mxu0 %vm141_vm1, %v140_v0  ;;  %19 = vst.msk [vmem:[#allocation2] sm:$0xff] %vm18_vm0, %v140_v0  ;;  %v23_v3 = vld [vmem:[%s186_s1 + $0x8] sm:$0xff] }
   0x2   :  { %128 = vmatpush3.msra.mxu0 %v25_v1  ;;  %v22_v4 = vld [vmem:[%s186_s1] sm:$0xff] }
   0x3   :  { %129 = vmatprep.subr.mxu0 %v140_v0  ;;  %v21_v5 = vld [vmem:[%s187_s0] sm:$0xff] }
   0x4   :  { %130 = vmatpush3.msra.mxu0 %v24_v2  ;;  %v121_v10 = vld [vmem:[%s188_s2] ss:$0 sm:$0xff] }
   0x5   :  { %131 = vmatprep.subr.mxu0 %v140_v0 }
   0x6   :  { %132 = vmatpush3.msra.mxu0 %v23_v3 }
   0x7   :  { %133 = vmatprep.subr.mxu0 %v140_v0 }
   0x8   :  { %134 = vmatpush3.msra.mxu0 %v22_v4  ;;  %v20_v6 = vld [vmem:[#allocation2] sm:$0xff] }
   0x9   :  { %136 = vmatmul.mubr.msk.f32.vlgmr.msra.gmra.mxu0 %vm26_vm2, %v21_v5 }
  0xc9   :  { %v96_v7 = vpop.f32.mrf.mxu0 }
  0xca   :  { %v100_v8 = vadd.f32 %v96_v7, %v20_v6 }
  0xcb   :  { %v137_v9 = vpop.f32.mrf.mxu0 }
  0xcc   :  { %102 = vst.msk [vmem:[#allocation2] sm:$0xff] %vm18_vm0, %v100_v8 }
  0xd3   :  { %v106_v11 = vld [vmem:[#allocation2] sm:$0xff] }
  0xd4   :  { %v114_v12 = vadd.f32 %v121_v10, %v106_v11 }
  0xd6   :  { %115 = vst.msk [vmem:[%s189_s3] sm:$0xff] %vm18_vm0, %v114_v12 }

// kernel: closed_call.18
= control target key start
LH: loop header
LB: loop body
LE: loop exit
PB: predicated region body
PF: predicated region fallthrough
CT: control target
= control target key end

     0   :  { %vm27_vm0 = vcmask 261120   ;;  %v184_v0 = vmov 0.0   ;;  %vm185_vm1 = vmmov 0   ;;  %s257_s1 = inlined_call_operand.vmem [shape: f32[32,32], index: 1, kind: input, shape index: {}]   ;;  %s258_s0 = inlined_call_operand.vmem [shape: f32[8,32], index: 0, kind: input, shape index: {}]   ;;  %s259_s2 = inlined_call_operand.vmem [shape: f32[1,32], index: 2, kind: input, shape index: {}]   ;;  %s260_s3 = inlined_call_operand.vmem [shape: f32[8,32], index: 3, kind: input, shape index: {}]   ;;  %s261_s4 = inlined_call_operand.vmem [shape: f32[1,32], index: 4, kind: input, shape index: {}]   ;;  %s262_s5 = inlined_call_operand.vmem [shape: f32[1,32], index: 5, kind: input, shape index: {}]   ;;  %s263_s6 = inlined_call_operand.vmem [shape: f32[8,32], index: 6, kind: output, shape index: {}]  }
   0x1   :  { %169 = vmatprep.subr.mxu0 %v184_v0  ;;  %v34_v1 = vld [vmem:[%s257_s1 + $0x18] sm:$0xff]  ;;  %v33_v2 = vld [vmem:[%s257_s1 + $0x10] sm:$0xff]  ;;  %177 = vmatprep.mubr.msk.f32.mxu0 %vm185_vm1, %v184_v0  ;;  %28 = vst.msk [vmem:[#allocation2] sm:$0xff] %vm27_vm0, %v184_v0  ;;  %v32_v3 = vld [vmem:[%s257_s1 + $0x8] sm:$0xff] }
   0x2   :  { %170 = vmatpush3.msra.mxu0 %v34_v1  ;;  %v31_v4 = vld [vmem:[%s257_s1] sm:$0xff] }
   0x3   :  { %171 = vmatprep.subr.mxu0 %v184_v0  ;;  %v30_v5 = vld [vmem:[%s258_s0] sm:$0xff] }
   0x4   :  { %172 = vmatpush3.msra.mxu0 %v33_v2  ;;  %v161_v10 = vld [vmem:[%s259_s2] ss:$0 sm:$0xff] }
   0x5   :  { %173 = vmatprep.subr.mxu0 %v184_v0  ;;  %v123_v12 = vld [vmem:[%s260_s3] sm:$0xff] }
   0x6   :  { %174 = vmatpush3.msra.mxu0 %v32_v3  ;;  %v162_v25 = vld [vmem:[%s261_s4] ss:$0 sm:$0xff] }
   0x7   :  { %175 = vmatprep.subr.mxu0 %v184_v0  ;;  %v163_v27 = vld [vmem:[%s262_s5] ss:$0 sm:$0xff] }
   0x8   :  { %176 = vmatpush3.msra.mxu0 %v31_v4  ;;  %v29_v6 = vld [vmem:[#allocation2] sm:$0xff] }
   0x9   :  { %178 = vmatmul.mubr.msk.f32.vlgmr.msra.gmra.mxu0 %vm27_vm0, %v30_v5 }
  0xc9   :  { %v105_v7 = vpop.f32.mrf.mxu0 }
  0xca   :  { %v109_v8 = vadd.f32 %v105_v7, %v29_v6 }
  0xcb   :  { %v179_v9 = vpop.f32.mrf.mxu0 }
  0xcc   :  { %110 = vst.msk [vmem:[#allocation2] sm:$0xff] %vm27_vm0, %v109_v8 }
  0xd3   :  { %v114_v11 = vld [vmem:[#allocation2] sm:$0xff] }
  0xd4   :  { %v122_v13 = vadd.f32 %v161_v10, %v114_v11 }
  0xd6   :  { %v124_v14 = vadd.f32 %v123_v12, %v122_v13 }
  0xd8   :  { %v125_v15 = vsel %vm27_vm0, %v124_v14, 0.0 }
  0xd9   :  { %126 = vadd.xlane.f32.xlu0 %v125_v15 }
 0x162   :  { %v127_v16 = vpop.xlane.xlu0 %126 }
 0x163   :  { %v129_v17 = vmul.f32 0.03125, %v127_v16 }
 0x165   :  { %v130_v18 = vsub.f32 %v124_v14, %v129_v17 }
 0x167   :  { %v131_v19 = vmul.f32 %v130_v18, %v130_v18 }
 0x169   :  { %v132_v20 = vsel %vm27_vm0, %v131_v19, 0.0 }
 0x16a   :  { %133 = vadd.xlane.f32.xlu0 %v132_v20 }
 0x1f3   :  { %v134_v21 = vpop.xlane.xlu0 %133 }
 0x1f4   :  { %v135_v22 = vmul.f32 0.03125, %v134_v21 }
 0x1f6   :  { %v136_v23 = vadd.f32 1e-12, %v135_v22 }
 0x1f8   :  { %182 = vrsqrt.f32 %v136_v23 }
 0x205   :  { %v183_v24 = vpop.eup %182 }
 0x206   :  { %v138_v26 = vmul.f32 %v183_v24, %v130_v18 }
 0x208   :  { %v146_v28 = vmul.f32 %v162_v25, %v138_v26 }
 0x20a   :  { %v154_v29 = vadd.f32 %v163_v27, %v146_v28 }
 0x20c   :  { %155 = vst.msk [vmem:[%s263_s6] sm:$0xff] %vm27_vm0, %v154_v29 }

// kernel: closed_call.17
= control target key start
LH: loop header
LB: loop body
LE: loop exit
PB: predicated region body
PF: predicated region fallthrough
CT: control target
= control target key end

     0   :  { %v809_v1 = vmov 0.0   ;;  %vm810_vm0 = vmmov 0   ;;  %s811_s14 = smov 96   ;;  %vm27_vm1 = vcmask 64512   ;;  %s813_s17 = smov 88   ;;  %vm698_vm2 = vcmask 130048   ;;  %s919_s1 = inlined_call_operand.vmem [shape: f32[8,96], index: 1, kind: input, shape index: {}, may-alias: {0,1}]   ;;  %s920_s0 = inlined_call_operand.vmem [shape: f32[8,96], index: 0, kind: input, shape index: {}, may-alias: {0,1}]   ;;  %s921_s2 = inlined_call_operand.vmem [shape: f32[1,8], index: 2, kind: input, shape index: {}]   ;;  %s922_s3 = inlined_call_operand.vmem [shape: f32[8,32], index: 3, kind: output, shape index: {}]  }
   0x1   :  { %v848_v0 = vld [vmem:[%s919_s1] sm:$0xff]  ;;  %737 = vmatprep.subr.mxu0 %v809_v1  ;;  %739 = vmatprep.mubr.msk.f32.mxu0 %vm810_vm0, %v809_v1  ;;  %s812_s1 = smov 64   ;;  %s814_s18 = smov 120   ;;  %vm700_vm3 = vcmask 195584   ;;  %vm702_vm4 = vcmask 261120  }
   0x2   :  { %25 = vrot.lane.b32.xlu0 %v848_v0, %s811_s14  ;;  %742 = vmatprep.subr.mxu1 %v809_v1  ;;  %v15_v2 = vld [vmem:[%s920_s0] sm:$0xff]  ;;  %s815_s0 = smov 80   ;;  %s816_s19 = smov 112  }
   0x3   :  { %744 = vmatprep.mubr.msk.f32.mxu1 %vm810_vm0, %v809_v1  ;;  %v16_v4 = vmul.f32 0.35355338, %v15_v2  ;;  %113 = vrot.lane.b32.xlu1 %v848_v0, %s812_s1  ;;  %s817_s20 = smov 72   ;;  %s818_s21 = smov 104   ;;  %v708_v5 = vld [vmem:[%s921_s2] ss:$0 sm:$0xff] }
   0x4   :  { %s819_s24 = smov 56   ;;  %s820_s2 = smov 48  }
   0x5   :  { %s821_s25 = smov 40   ;;  %s822_s26 = smov 8  }
   0x6   :  { %s823_s27 = smov 16   ;;  %s824_s28 = smov 24  }
   0x7   :  { %192 = vrot.lane.b32.xlu1 %v848_v0, %s813_s17 }
   0xb   :  { %190 = vrot.lane.b32.xlu1 %v16_v4, %s814_s18 }
   0xf   :  { %357 = vrot.lane.b32.xlu1 %v848_v0, %s815_s0 }
  0x13   :  { %355 = vrot.lane.b32.xlu1 %v16_v4, %s816_s19 }
  0x17   :  { %522 = vrot.lane.b32.xlu1 %v848_v0, %s817_s20 }
  0x1b   :  { %520 = vrot.lane.b32.xlu1 %v16_v4, %s818_s21 }
  0x74   :  { %v26_v3 = vpop.permute.xlu0 %25 }
  0x75   :  { %738 = vmatpush3.xpose.msk.msra.mxu0 %vm27_vm1, %v26_v3  ;;  %v114_v10 = vpop.permute.xlu1 %113 }
  0x76   :  { %752 = vmatprep.subr.mxu0 %v809_v1  ;;  %743 = vmatpush3.msra.mxu1 %v114_v10 }
  0x77   :  { %747 = vmatprep.subr.mxu1 %v809_v1 }
  0x78   :  { %740 = vmatmul.mubr.msk.f32.vlgmr.msra.gmra.mxu0 %vm27_vm1, %v16_v4 }
  0x79   :  { %754 = vmatprep.mubr.msk.f32.mxu0 %vm810_vm0, %v809_v1  ;;  %v193_v11 = vpop.permute.xlu1 %192 }
  0x7d   :  { %v191_v15 = vpop.permute.xlu1 %190 }
  0x81   :  { %v358_v16 = vpop.permute.xlu1 %357 }
  0x85   :  { %v356_v17 = vpop.permute.xlu1 %355 }
  0x89   :  { %v523_v19 = vpop.permute.xlu1 %522 }
  0x8d   :  { %v521_v20 = vpop.permute.xlu1 %520 }
 0x138   :  { %v99_v6 = vpop.f32.mrf.mxu0 }
 0x139   :  { %v100_v7 = vadd.f32 %v708_v5, %v99_v6 }
 0x13a   :  { %v741_v8 = vpop.f32.mrf.mxu0 }
 0x13b   :  { %v103_v9 = vsel %vm27_vm1, %v100_v7, -inf }
 0x13c   :  { %104 = vmax.xlane.f32.xlu0 %v103_v9 }
 0x152   :  { %278 = vrot.lane.b32.xlu0 %v848_v0, %s819_s24 }
 0x1c5   :  { %v105_v12 = vpop.xlane.xlu0 %104 }
 0x1c6   :  { %v106_v13 = vsub.f32 %v100_v7, %v105_v12 }
 0x1c8   :  { %v107_v14 = vmul.f32 1.442695, %v106_v13 }
 0x1c9   :  { %v279_v21 = vpop.permute.xlu0 %278 }
 0x1ca   :  { %793 = vpow2.f32 %v107_v14  ;;  %753 = vmatpush3.msra.mxu0 %v279_v21 }
 0x1cb   :  { %762 = vmatprep.subr.mxu0 %v809_v1 }
 0x1d7   :  { %v875_v18 = vpop.eup %793 }
 0x1d8   :  { %745 = vmatmul.mubr.msk.f32.vlgmr.msra.gmra.mxu1 %vm27_vm1, %v875_v18  ;;  %v109_v53 = vsel %vm27_vm1, %v875_v18, 0.0 }
 0x1d9   :  { %748 = vmatpush3.xpose.msk.msra.mxu1 %vm27_vm1, %v193_v11  ;;  %749 = vmatprep.mubr.msk.f32.mxu1 %vm810_vm0, %v809_v1 }
 0x1da   :  { %757 = vmatprep.subr.mxu1 %v809_v1 }
 0x1dc   :  { %750 = vmatmul.mubr.msk.f32.vlgmr.msra.gmra.mxu1 %vm27_vm1, %v191_v15 }
 0x1dd   :  { %758 = vmatpush3.xpose.msk.msra.mxu1 %vm27_vm1, %v358_v16  ;;  %759 = vmatprep.mubr.msk.f32.mxu1 %vm810_vm0, %v809_v1 }
 0x1de   :  { %767 = vmatprep.subr.mxu1 %v809_v1 }
 0x1e0   :  { %760 = vmatmul.mubr.msk.f32.vlgmr.msra.gmra.mxu1 %vm27_vm1, %v356_v17 }
 0x1e1   :  { %768 = vmatpush3.xpose.msk.msra.mxu1 %vm27_vm1, %v523_v19  ;;  %769 = vmatprep.mubr.msk.f32.mxu1 %vm810_vm0, %v809_v1 }
 0x1e4   :  { %770 = vmatmul.mubr.msk.f32.vlgmr.msra.gmra.mxu1 %vm27_vm1, %v521_v20 }
 0x298   :  { %v894_v22 = vpop.f32.mrf.mxu1 }
 0x29a   :  { %v746_v23 = vpop.f32.mrf.mxu1 }
 0x29c   :  { %v264_v24 = vpop.f32.mrf.mxu1 }
 0x29d   :  { %v265_v25 = vadd.f32 %v708_v5, %v264_v24 }
 0x29e   :  { %v751_v26 = vpop.f32.mrf.mxu1 }
 0x29f   :  { %v268_v27 = vsel %vm27_vm1, %v265_v25, -inf }
 0x2a0   :  { %269 = vmax.xlane.f32.xlu1 %v268_v27  ;;  %v429_v28 = vpop.f32.mrf.mxu1 }
 0x2a1   :  { %v430_v29 = vadd.f32 %v708_v5, %v429_v28 }
 0x2a2   :  { %v761_v30 = vpop.f32.mrf.mxu1 }
 0x2a3   :  { %v433_v31 = vsel %vm27_vm1, %v430_v29, -inf }
 0x2a4   :  { %434 = vmax.xlane.f32.xlu0 %v433_v31  ;;  %v594_v32 = vpop.f32.mrf.mxu1 }
 0x2a5   :  { %v595_v33 = vadd.f32 %v708_v5, %v594_v32 }
 0x2a6   :  { %v771_v34 = vpop.f32.mrf.mxu1 }
 0x2a7   :  { %v598_v35 = vsel %vm27_vm1, %v595_v33, -inf }
 0x2a8   :  { %599 = vmax.xlane.f32.xlu0 %v598_v35 }
 0x2b1   :  { %443 = vrot.lane.b32.xlu1 %v848_v0, %s820_s2 }
 0x2be   :  { %608 = vrot.lane.b32.xlu0 %v848_v0, %s821_s25 }
 0x329   :  { %v270_v36 = vpop.xlane.xlu1 %269 }
 0x32a   :  { %v271_v37 = vsub.f32 %v265_v25, %v270_v36 }
 0x32c   :  { %v272_v38 = vmul.f32 1.442695, %v271_v37 }
 0x32d   :  { %v435_v39 = vpop.xlane.xlu0 %434  ;;  %v444_v45 = vpop.permute.xlu1 %443 }
 0x32e   :  { %795 = vpow2.f32 %v272_v38  ;;  %v436_v40 = vsub.f32 %v430_v29, %v435_v39 }
 0x330   :  { %v437_v41 = vmul.f32 1.442695, %v436_v40 }
 0x331   :  { %v600_v42 = vpop.xlane.xlu0 %599 }
 0x332   :  { %797 = vpow2.f32 %v437_v41  ;;  %v601_v43 = vsub.f32 %v595_v33, %v600_v42 }
 0x334   :  { %v602_v44 = vmul.f32 1.442695, %v601_v43 }
 0x335   :  { %v609_v48 = vpop.permute.xlu0 %608 }
 0x336   :  { %799 = vpow2.f32 %v602_v44 }
 0x33b   :  { %v796_v46 = vpop.eup %795 }
 0x33c   :  { %755 = vmatmul.mubr.msk.f32.vlgmr.msra.gmra.mxu0 %vm27_vm1, %v796_v46  ;;  %v274_v47 = vsel %vm27_vm1, %v796_v46, 0.0 }
 0x33d   :  { %763 = vmatpush3.msra.mxu0 %v444_v45  ;;  %275 = vadd.xlane.f32.xlu0 %v274_v47 }
 0x33e   :  { %764 = vmatprep.mubr.msk.f32.mxu0 %vm810_vm0, %v809_v1  ;;  %772 = vmatprep.subr.mxu0 %v809_v1 }
 0x33f   :  { %v798_v49 = vpop.eup %797 }
 0x340   :  { %765 = vmatmul.mubr.msk.f32.vlgmr.msra.gmra.mxu0 %vm27_vm1, %v798_v49  ;;  %v439_v50 = vsel %vm27_vm1, %v798_v49, 0.0 }
 0x341   :  { %773 = vmatpush3.msra.mxu0 %v609_v48  ;;  %440 = vadd.xlane.f32.xlu1 %v439_v50 }
 0x342   :  { %774 = vmatprep.mubr.msk.f32.mxu0 %vm810_vm0, %v809_v1 }
 0x343   :  { %v800_v51 = vpop.eup %799 }
 0x344   :  { %775 = vmatmul.mubr.msk.f32.vlgmr.msra.gmra.mxu0 %vm27_vm1, %v800_v51  ;;  %v604_v52 = vsel %vm27_vm1, %v800_v51, 0.0 }
 0x345   :  { %605 = vadd.xlane.f32.xlu0 %v604_v52 }
 0x349   :  { %110 = vadd.xlane.f32.xlu0 %v109_v53 }
 0x3c6   :  { %v276_v54 = vpop.xlane.xlu0 %275 }
 0x3c7   :  { %801 = vrcp.f32 %v276_v54 }
 0x3ca   :  { %v441_v55 = vpop.xlane.xlu1 %440 }
 0x3cb   :  { %803 = vrcp.f32 %v441_v55 }
 0x3ce   :  { %v606_v56 = vpop.xlane.xlu0 %605 }
 0x3cf   :  { %805 = vrcp.f32 %v606_v56 }
 0x3d2   :  { %v111_v5 = vpop.xlane.xlu0 %110 }
 0x3d3   :  { %807 = vrcp.f32 %v111_v5 }
 0x3d4   :  { %v802_v57 = vpop.eup %801 }
 0x3d8   :  { %v804_v61 = vpop.eup %803 }
 0x3dc   :  { %v806_v1 = vpop.eup %805 }
 0x3e0   :  { %v808_v6 = vpop.eup %807 }
 0x3e1   :  { %v189_v8 = vmul.f32 %v808_v6, %v894_v22 }
 0x3fc   :  { %v350_v58 = vpop.f32.mrf.mxu0 }
 0x3fd   :  { %v354_v59 = vmul.f32 %v802_v57, %v350_v58 }
 0x3fe   :  { %v756_v60 = vpop.f32.mrf.mxu0 }
 0x3ff   :  { %686 = vrot.lane.b32.xlu0 %v354_v59, %s822_s26 }
 0x400   :  { %v515_v62 = vpop.f32.mrf.mxu0 }
 0x401   :  { %v519_v63 = vmul.f32 %v804_v61, %v515_v62 }
 0x402   :  { %v766_v0 = vpop.f32.mrf.mxu0 }
 0x403   :  { %690 = vrot.lane.b32.xlu1 %v519_v63, %s823_s27 }
 0x404   :  { %v680_v2 = vpop.f32.mrf.mxu0 }
 0x405   :  { %v684_v3 = vmul.f32 %v806_v1, %v680_v2 }
 0x406   :  { %v776_v4 = vpop.f32.mrf.mxu0 }
 0x407   :  { %694 = vrot.lane.b32.xlu0 %v684_v3, %s824_s28 }
 0x471   :  { %v687_v7 = vpop.permute.xlu0 %686 }
 0x472   :  { %v697_v10 = vsel %vm27_vm1, %v189_v8, %v687_v7 }
 0x475   :  { %v691_v9 = vpop.permute.xlu1 %690 }
 0x476   :  { %v699_v11 = vsel %vm698_vm2, %v697_v10, %v691_v9 }
 0x479   :  { %v695_v12 = vpop.permute.xlu0 %694 }
 0x47a   :  { %v701_v13 = vsel %vm700_vm3, %v699_v11, %v695_v12 }
 0x47b   :  { %703 = vst.msk [vmem:[%s922_s3] sm:$0xff] %vm702_vm4, %v701_v13 }

// kernel: closed_call.20
= control target key start
LH: loop header
LB: loop body
LE: loop exit
PB: predicated region body
PF: predicated region fallthrough
CT: control target
= control target key end

     0   :  { %vm27_vm0 = vcmask 261120   ;;  %v201_v0 = vmov 0.0   ;;  %vm202_vm1 = vmmov 0   ;;  %vm39_vm2 = vcmask 523264   ;;  %s285_s1 = inlined_call_operand.vmem [shape: f32[64,32], index: 1, kind: input, shape index: {}]   ;;  %s286_s0 = inlined_call_operand.vmem [shape: f32[8,64], index: 0, kind: input, shape index: {}]   ;;  %s287_s2 = inlined_call_operand.vmem [shape: f32[1,32], index: 2, kind: input, shape index: {}]   ;;  %s288_s3 = inlined_call_operand.vmem [shape: f32[8,32], index: 3, kind: input, shape index: {}]   ;;  %s289_s4 = inlined_call_operand.vmem [shape: f32[1,32], index: 4, kind: input, shape index: {}]   ;;  %s290_s5 = inlined_call_operand.vmem [shape: f32[1,32], index: 5, kind: input, shape index: {}]   ;;  %s291_s6 = inlined_call_operand.vmem [shape: f32[8,32], index: 6, kind: output, shape index: {}]  }
   0x1   :  { %178 = vmatprep.subr.mxu0 %v201_v0  ;;  %v38_v1 = vld [vmem:[%s285_s1 + $0x38] sm:$0xff]  ;;  %v37_v2 = vld [vmem:[%s285_s1 + $0x30] sm:$0xff]  ;;  %194 = vmatprep.mubr.msk.f32.mxu0 %vm202_vm1, %v201_v0  ;;  %28 = vst.msk [vmem:[#allocation2] sm:$0xff] %vm27_vm0, %v201_v0  ;;  %v36_v3 = vld [vmem:[%s285_s1 + $0x28] sm:$0xff] }
   0x2   :  { %179 = vmatpush3.msra.mxu0 %v38_v1  ;;  %v35_v4 = vld [vmem:[%s285_s1 + $0x20] sm:$0xff]  ;;  %v34_v5 = vld [vmem:[%s285_s1 + $0x18] sm:$0xff]  ;;  %v33_v6 = vld [vmem:[%s285_s1 + $0x10] sm:$0xff] }
   0x3   :  { %180 = vmatprep.subr.mxu0 %v201_v0  ;;  %v32_v7 = vld [vmem:[%s285_s1 + $0x8] sm:$0xff]  ;;  %v31_v8 = vld [vmem:[%s285_s1] sm:$0xff] }
   0x4   :  { %181 = vmatpush3.msra.mxu0 %v37_v2  ;;  %v30_v9 = vld [vmem:[%s286_s0] sm:$0xff] }
   0x5   :  { %182 = vmatprep.subr.mxu0 %v201_v0  ;;  %v166_v14 = vld [vmem:[%s287_s2] ss:$0 sm:$0xff] }
   0x6   :  { %183 = vmatpush3.msra.mxu0 %v36_v3  ;;  %v128_v16 = vld [vmem:[%s288_s3] sm:$0xff] }
   0x7   :  { %184 = vmatprep.subr.mxu0 %v201_v0  ;;  %v167_v29 = vld [vmem:[%s289_s4] ss:$0 sm:$0xff] }
   0x8   :  { %185 = vmatpush3.msra.mxu0 %v35_v4  ;;  %v29_v10 = vld [vmem:[#allocation2] sm:$0xff] }
   0x9   :  { %186 = vmatprep.subr.mxu0 %v201_v0  ;;  %v168_v31 = vld [vmem:[%s290_s5] ss:$0 sm:$0xff] }
   0xa   :  { %187 = vmatpush3.msra.mxu0 %v34_v5 }
   0xb   :  { %188 = vmatprep.subr.mxu0 %v201_v0 }
   0xc   :  { %189 = vmatpush3.msra.mxu0 %v33_v6 }
   0xd   :  { %190 = vmatprep.subr.mxu0 %v201_v0 }
   0xe   :  { %191 = vmatpush3.msra.mxu0 %v32_v7 }
   0xf   :  { %192 = vmatprep.subr.mxu0 %v201_v0 }
  0x10   :  { %193 = vmatpush3.msra.mxu0 %v31_v8 }
  0x11   :  { %195 = vmatmul.mubr.msk.f32.vlgmr.msra.gmra.mxu0 %vm39_vm2, %v30_v9 }
  0xd1   :  { %v109_v11 = vpop.f32.mrf.mxu0 }
  0xd2   :  { %v113_v12 = vadd.f32 %v109_v11, %v29_v10 }
  0xd3   :  { %v196_v13 = vpop.f32.mrf.mxu0 }
  0xd4   :  { %115 = vst.msk [vmem:[#allocation2] sm:$0xff] %vm27_vm0, %v113_v12 }
  0xdb   :  { %v119_v15 = vld [vmem:[#allocation2] sm:$0xff] }
  0xdc   :  { %v127_v17 = vadd.f32 %v166_v14, %v119_v15 }
  0xde   :  { %v129_v18 = vadd.f32 %v128_v16, %v127_v17 }
  0xe0   :  { %v130_v19 = vsel %vm27_vm0, %v129_v18, 0.0 }
  0xe1   :  { %131 = vadd.xlane.f32.xlu0 %v130_v19 }
 0x16a   :  { %v132_v20 = vpop.xlane.xlu0 %131 }
 0x16b   :  { %v134_v21 = vmul.f32 0.03125, %v132_v20 }
 0x16d   :  { %v135_v22 = vsub.f32 %v129_v18, %v134_v21 }
 0x16f   :  { %v136_v23 = vmul.f32 %v135_v22, %v135_v22 }
 0x171   :  { %v137_v24 = vsel %vm27_vm0, %v136_v23, 0.0 }
 0x172   :  { %138 = vadd.xlane.f32.xlu0 %v137_v24 }
 0x1fb   :  { %v139_v25 = vpop.xlane.xlu0 %138 }
 0x1fc   :  { %v140_v26 = vmul.f32 0.03125, %v139_v25 }
 0x1fe   :  { %v141_v27 = vadd.f32 1e-12, %v140_v26 }
 0x200   :  { %199 = vrsqrt.f32 %v141_v27 }
 0x20d   :  { %v200_v28 = vpop.eup %199 }
 0x20e   :  { %v143_v30 = vmul.f32 %v200_v28, %v135_v22 }
 0x210   :  { %v151_v32 = vmul.f32 %v167_v29, %v143_v30 }
 0x212   :  { %v159_v33 = vadd.f32 %v168_v31, %v151_v32 }
 0x214   :  { %160 = vst.msk [vmem:[%s291_s6] sm:$0xff] %vm27_vm0, %v159_v33 }

// kernel: closed_call.19
= control target key start
LH: loop header
LB: loop body
LE: loop exit
PB: predicated region body
PF: predicated region fallthrough
CT: control target
= control target key end

     0   :  { %vm18_vm0 = vcmask 523264   ;;  %v151_v0 = vmov 0.0   ;;  %vm152_vm1 = vmmov 0   ;;  %vm26_vm2 = vcmask 261120   ;;  %s197_s1 = inlined_call_operand.vmem [shape: f32[32,64], index: 1, kind: input, shape index: {}]   ;;  %s198_s0 = inlined_call_operand.vmem [shape: f32[8,32], index: 0, kind: input, shape index: {}]   ;;  %s199_s2 = inlined_call_operand.vmem [shape: f32[1,64], index: 2, kind: input, shape index: {}]   ;;  %s200_s3 = inlined_call_operand.vmem [shape: f32[8,64], index: 3, kind: output, shape index: {}]  }
   0x1   :  { %136 = vmatprep.subr.mxu0 %v151_v0  ;;  %v25_v1 = vld [vmem:[%s197_s1 + $0x18] sm:$0xff]  ;;  %v24_v2 = vld [vmem:[%s197_s1 + $0x10] sm:$0xff]  ;;  %144 = vmatprep.mubr.msk.f32.mxu0 %vm152_vm1, %v151_v0  ;;  %19 = vst.msk [vmem:[#allocation2] sm:$0xff] %vm18_vm0, %v151_v0  ;;  %v23_v3 = vld [vmem:[%s197_s1 + $0x8] sm:$0xff] }
   0x2   :  { %137 = vmatpush3.msra.mxu0 %v25_v1  ;;  %v22_v4 = vld [vmem:[%s197_s1] sm:$0xff] }
   0x3   :  { %138 = vmatprep.subr.mxu0 %v151_v0  ;;  %v21_v5 = vld [vmem:[%s198_s0] sm:$0xff] }
   0x4   :  { %139 = vmatpush3.msra.mxu0 %v24_v2  ;;  %v130_v10 = vld [vmem:[%s199_s2] ss:$0 sm:$0xff] }
   0x5   :  { %140 = vmatprep.subr.mxu0 %v151_v0 }
   0x6   :  { %141 = vmatpush3.msra.mxu0 %v23_v3 }
   0x7   :  { %142 = vmatprep.subr.mxu0 %v151_v0 }
   0x8   :  { %143 = vmatpush3.msra.mxu0 %v22_v4  ;;  %v20_v6 = vld [vmem:[#allocation2] sm:$0xff] }
   0x9   :  { %145 = vmatmul.mubr.msk.f32.vlgmr.msra.gmra.mxu0 %vm26_vm2, %v21_v5 }
  0xc9   :  { %v96_v7 = vpop.f32.mrf.mxu0 }
  0xca   :  { %v100_v8 = vadd.f32 %v96_v7, %v20_v6 }
  0xcb   :  { %v146_v9 = vpop.f32.mrf.mxu0 }
  0xcc   :  { %102 = vst.msk [vmem:[#allocation2] sm:$0xff] %vm18_vm0, %v100_v8 }
  0xd3   :  { %v106_v11 = vld [vmem:[#allocation2] sm:$0xff] }
  0xd4   :  { %v114_v12 = vadd.f32 %v130_v10, %v106_v11 }
  0xd6   :  { %v116_v13 = vmul.f32 0.044715, %v114_v12  ;;  %v115_v19 = vmul.f32 0.5, %v114_v12 }
  0xd8   :  { %v117_v14 = vmul.f32 %v116_v13, %v114_v12 }
  0xda   :  { %v118_v15 = vmul.f32 %v117_v14, %v114_v12 }
  0xdc   :  { %v119_v16 = vadd.f32 %v118_v15, %v114_v12 }
  0xde   :  { %v120_v17 = vmul.f32 0.7978846, %v119_v16 }
  0xe0   :  { %149 = vtanh.f32 %v120_v17 }
  0xed   :  { %v150_v18 = vpop.eup %149 }
  0xee   :  { %v122_v20 = vadd.f32 1.0, %v150_v18 }
  0xf0   :  { %v123_v21 = vmul.f32 %v122_v20, %v115_v19 }
  0xf2   :  { %124 = vst.msk [vmem:[%s200_s3] sm:$0xff] %vm18_vm0, %v123_v21 }

</bundles_post_ra>
